<compile_context>
chip_gen: v7x
topology: tpu7x:2x2x1
jax: 0.10.0
libtpu: 0.0.40
codegen_flags: <defaults>
</compile_context>

<pallas_src>
import functools
import math

import jax
import jax.numpy as jnp
import numpy as np
from jax.experimental import pallas as pl
from jax.experimental.pallas import tpu as pltpu


# ----------------------------------------------------------------------------
# Shared math helpers
# ----------------------------------------------------------------------------
def _layernorm(x, w, b, eps=1e-5):
    """PyTorch nn.LayerNorm over last dim (biased variance, eps inside sqrt)."""
    mu = jnp.mean(x, axis=-1, keepdims=True)
    xc = x - mu
    var = jnp.mean(xc * xc, axis=-1, keepdims=True)
    return xc * jax.lax.rsqrt(var + eps) * w + b


# ----------------------------------------------------------------------------
# Pallas kernel: whole CMAF layer (pos-enc add, MHSA, MHCA, 2x LayerNorm, MLP).
# Shapes are tiny, so every operand is a full-array VMEM block (no grid).
# TODO(synk): at production B/S, add a grid over batch (or 128-row tiles of
#             B*S) with dimension_semantics=("parallel",) so v7x's second
#             TensorCore is used and per-step VMEM stays bounded.
# ----------------------------------------------------------------------------
def cmaf_kernel(alpha_ref, beta_ref, pe_ref,
                slab_a_ref,   # (2D+2, 4D): [wq|wk|wv|wq_ca ; w1 ; b_qkvq ; b1]
                slab_b_ref,   # (D+1, 2D) : [wk_ca|wv_ca ; b_kv_ca]
                slab_o_ref,   # (6D+6, D) : [w2 ; wo_sa;wo_ca ; bo ; b2 ; n1w;n1b;n2w;n2b]
                out_ref, *, nhead):
    B, S, D = alpha_ref.shape
    H = nhead
    DH = D // H
    BS = B * S
    scale = 1.0 / math.sqrt(DH)

    # ---- positional encoding (dropout = identity in eval mode) -------------
    pe = pe_ref[...]                                               # (S, D)
    alpha2 = (alpha_ref[...] + pe[None]).reshape(BS, D)
    beta2 = (beta_ref[...] + pe[None]).reshape(BS, D)

    # ---- unpack parameter slabs (static slices, zero-copy views) -----------
    w_a = slab_a_ref[0:D, :]                                       # (D, 4D)
    w1 = slab_a_ref[D:2 * D, :]                                    # (D, 4D)
    ba_blk = slab_a_ref[2 * D:2 * D + 2, :]                        # (2, 4D)
    b_a, b1 = ba_blk[0:1], ba_blk[1:2]

    w_b = slab_b_ref[0:D, :]                                       # (D, 2D)
    b_b = slab_b_ref[D:D + 1, :]                                   # (1, 2D)

    w2 = slab_o_ref[0:4 * D, :]                                    # (4D, D)
    w_o = slab_o_ref[4 * D:6 * D, :]                               # (2D, D)
    tail = slab_o_ref[6 * D:6 * D + 6, :]                          # (6, D)
    b_o, b2 = tail[0:1], tail[1:2]
    n1w, n1b = tail[2:3], tail[3:4]
    n2w, n2b = tail[4:5], tail[5:6]

    # ---- fused projections (lane-dense N = 4D / 2D) ------------------------
    # columns of qkvq: [ q_sa | k_sa | v_sa | q_ca ]
    qkvq = jnp.dot(alpha2, w_a, preferred_element_type=jnp.float32) + b_a
    # columns of kv_b: [ k_ca | v_ca ]
    kv_b = jnp.dot(beta2, w_b, preferred_element_type=jnp.float32) + b_b

    def heads(x2d, off):
        # (BS, ...) -> (B*H, S, DH): per-head static lane slice, leading-dim
        # reshape, concat on a new leading axis (no sublane/lane transpose).
        cols = [x2d[:, off + h * DH: off + (h + 1) * DH].reshape(B, 1, S, DH)
                for h in range(H)]
        return jnp.concatenate(cols, axis=1).reshape(B * H, S, DH)

    def unheads(xbh):
        # (B*H, S, DH) -> (BS, D)
        x4 = xbh.reshape(B, H, S, DH)
        return jnp.concatenate(
            [x4[:, h:h + 1].reshape(B, S, DH) for h in range(H)],
            axis=-1).reshape(BS, D)

    def attention(q_src, q_off, kv_src, k_off, v_off):
        q = heads(q_src, q_off) * scale
        k = heads(kv_src, k_off)
        v = heads(kv_src, v_off)
        s = jnp.einsum('bqd,bkd->bqk', q, k,
                       preferred_element_type=jnp.float32)        # (B*H, S, S)
        s = s - jnp.max(s, axis=-1, keepdims=True)
        p = jnp.exp(s)
        # Exact normalisation (matches the reference softmax bit-for-bit up to
        # accumulation order); the approximate EUP reciprocal previously used
        # here introduced >2e-3 output error.
        p = p / jnp.sum(p, axis=-1, keepdims=True)
        ctx = jnp.einsum('bqk,bkd->bqd', p, v,
                         preferred_element_type=jnp.float32)      # (B*H, S, DH)
        return unheads(ctx)

    ctx_sa = attention(qkvq, 0, qkvq, D, 2 * D)        # self-attn on alpha
    ctx_ca = attention(qkvq, 3 * D, kv_b, 0, D)        # cross-attn q=alpha kv=beta

    # fused output projection of both attention branches (bias = bo_sa + bo_ca)
    ctx = jnp.concatenate([ctx_sa, ctx_ca], axis=-1)               # (BS, 2D)
    attn = jnp.dot(ctx, w_o, preferred_element_type=jnp.float32) + b_o

    x = _layernorm(alpha2 + attn, n1w, n1b)

    # MLP: linear1 -> relu -> linear2 (dropouts are identity)
    hid = jnp.maximum(
        jnp.dot(x, w1, preferred_element_type=jnp.float32) + b1, 0.0)
    mlp = jnp.dot(hid, w2, preferred_element_type=jnp.float32) + b2

    out_ref[...] = _layernorm(x + mlp, n2w, n2b)                   # (BS, D)


# ----------------------------------------------------------------------------
# Host-side parameter packing into 3 contiguous slabs (one DMA each)
# ----------------------------------------------------------------------------
def pack_params(p, D):
    w_a = jnp.concatenate([p['sa_wq'], p['sa_wk'], p['sa_wv'], p['ca_wq']], axis=1)
    b_a = jnp.concatenate([p['sa_bq'], p['sa_bk'], p['sa_bv'], p['ca_bq']], axis=1)
    w_b = jnp.concatenate([p['ca_wk'], p['ca_wv']], axis=1)
    b_b = jnp.concatenate([p['ca_bk'], p['ca_bv']], axis=1)
    w_o = jnp.concatenate([p['sa_wo'], p['ca_wo']], axis=0)
    b_o = p['sa_bo'] + p['ca_bo']      # both attention outputs are summed

    slab_a = jnp.concatenate([w_a, p['w1'], b_a, p['b1']], axis=0)          # (2D+2, 4D)
    slab_b = jnp.concatenate([w_b, b_b], axis=0)                            # (D+1, 2D)
    slab_o = jnp.concatenate([p['w2'], w_o, b_o, p['b2'],
                              p['n1_w'], p['n1_b'],
                              p['n2_w'], p['n2_b']], axis=0)                # (6D+6, D)
    return slab_a, slab_b, slab_o


def cmaf_layer(alpha, beta, params, pe, *, nhead):
    B, S, D = alpha.shape
    BS, DH = B * S, D // nhead
    slab_a, slab_b, slab_o = pack_params(params, D)
    pe_s = pe[:S]

    flops = (2 * BS * D * 4 * D          # fused alpha projection
             + 2 * BS * D * 2 * D        # fused beta projection
             + 2 * BS * 2 * D * D        # fused output projection
             + 2 * BS * D * 4 * D        # linear1
             + 2 * BS * 4 * D * D        # linear2
             + 2 * 2 * B * nhead * S * S * DH * 2)   # scores + ctx, SA + CA
    transcendentals = 2 * B * nhead * S * S + 2 * B * nhead * S + 2 * BS
    bytes_accessed = 4 * (alpha.size + beta.size + pe_s.size
                          + slab_a.size + slab_b.size + slab_o.size + BS * D)

    kernel = functools.partial(cmaf_kernel, nhead=nhead)
    out2d = pl.pallas_call(
        kernel,
        out_shape=jax.ShapeDtypeStruct((BS, D), jnp.float32),
        in_specs=[pl.BlockSpec(memory_space=pltpu.MemorySpace.VMEM)] * 6,
        out_specs=pl.BlockSpec(memory_space=pltpu.MemorySpace.VMEM),
        cost_estimate=pl.CostEstimate(flops=flops,
                                      transcendentals=transcendentals,
                                      bytes_accessed=bytes_accessed),
    )(alpha, beta, pe_s, slab_a, slab_b, slab_o)
    return out2d.reshape(B, S, D)


# ----------------------------------------------------------------------------
# Deterministic parameter construction + positional-encoding buffer
# ----------------------------------------------------------------------------
def make_pe(d_model, max_len=200):
    position = np.arange(max_len, dtype=np.float32)[:, None]
    div_term = np.exp(np.arange(0, d_model, 2, dtype=np.float32) *
                      (-math.log(10000.0) / d_model))
    pe = np.zeros((max_len, d_model), dtype=np.float32)
    pe[:, 0::2] = np.sin(position * div_term)
    pe[:, 1::2] = np.cos(position * div_term)
    return jnp.asarray(pe)


def make_params(d_model, key):
    ks = jax.random.split(key, 20)
    s = 1.0 / math.sqrt(d_model)

    def w(k, shape, scale):
        return jax.random.normal(k, shape, dtype=jnp.float32) * scale

    p = {}
    # MHSA (weights already transposed: (in, out))
    p['sa_wq'] = w(ks[0], (d_model, d_model), s)
    p['sa_wk'] = w(ks[1], (d_model, d_model), s)
    p['sa_wv'] = w(ks[2], (d_model, d_model), s)
    p['sa_wo'] = w(ks[3], (d_model, d_model), s)
    p['sa_bq'] = w(ks[4], (1, d_model), 0.02)
    p['sa_bk'] = w(ks[5], (1, d_model), 0.02)
    p['sa_bv'] = w(ks[6], (1, d_model), 0.02)
    p['sa_bo'] = w(ks[7], (1, d_model), 0.02)
    # MHCA
    p['ca_wq'] = w(ks[8], (d_model, d_model), s)
    p['ca_wk'] = w(ks[9], (d_model, d_model), s)
    p['ca_wv'] = w(ks[10], (d_model, d_model), s)
    p['ca_wo'] = w(ks[11], (d_model, d_model), s)
    p['ca_bq'] = w(ks[12], (1, d_model), 0.02)
    p['ca_bk'] = w(ks[13], (1, d_model), 0.02)
    p['ca_bv'] = w(ks[14], (1, d_model), 0.02)
    p['ca_bo'] = w(ks[15], (1, d_model), 0.02)
    # LayerNorms (PyTorch default init)
    p['n1_w'] = jnp.ones((1, d_model), jnp.float32)
    p['n1_b'] = jnp.zeros((1, d_model), jnp.float32)
    p['n2_w'] = jnp.ones((1, d_model), jnp.float32)
    p['n2_b'] = jnp.zeros((1, d_model), jnp.float32)
    # MLP
    p['w1'] = w(ks[16], (d_model, 4 * d_model), s)
    p['b1'] = w(ks[17], (1, 4 * d_model), 0.02)
    p['w2'] = w(ks[18], (4 * d_model, d_model), 1.0 / math.sqrt(4 * d_model))
    p['b2'] = w(ks[19], (1, d_model), 0.02)
    return p


# ----------------------------------------------------------------------------
# Plain-JAX reference (unfused, per-batch/per-head loops) for correctness check
# ----------------------------------------------------------------------------
def _mha_ref(xq, xkv, wq, wk, wv, bq, bk, bv, wo, bo, *, B, S, D, H):
    DH = D // H
    scale = 1.0 / math.sqrt(DH)
    q = jnp.dot(xq, wq) + bq
    k = jnp.dot(xkv, wk) + bk
    v = jnp.dot(xkv, wv) + bv
    batch_out = []
    for b_i in range(B):
        rs = slice(b_i * S, (b_i + 1) * S)
        head_out = []
        for h in range(H):
            cs = slice(h * DH, (h + 1) * DH)
            sc = jnp.dot(q[rs, cs] * scale, k[rs, cs].T)
            sc = sc - jnp.max(sc, axis=-1, keepdims=True)
            p = jnp.exp(sc)
            p = p / jnp.sum(p, axis=-1, keepdims=True)
            head_out.append(jnp.dot(p, v[rs, cs]))
        batch_out.append(jnp.concatenate(head_out, axis=-1))
    ctx = jnp.concatenate(batch_out, axis=0)
    return jnp.dot(ctx, wo) + bo


def cmaf_reference(alpha, beta, params, pe, *, nhead):
    B, S, D = alpha.shape
    a2 = (alpha + pe[:S][None]).reshape(B * S, D)
    b2 = (beta + pe[:S][None]).reshape(B * S, D)
    x_sa = _mha_ref(a2, a2, params['sa_wq'], params['sa_wk'], params['sa_wv'],
                    params['sa_bq'], params['sa_bk'], params['sa_bv'],
                    params['sa_wo'], params['sa_bo'], B=B, S=S, D=D, H=nhead)
    x_ca = _mha_ref(a2, b2, params['ca_wq'], params['ca_wk'], params['ca_wv'],
                    params['ca_bq'], params['ca_bk'], params['ca_bv'],
                    params['ca_wo'], params['ca_bo'], B=B, S=S, D=D, H=nhead)
    x = _layernorm(a2 + x_sa + x_ca, params['n1_w'], params['n1_b'])
    h = jnp.maximum(jnp.dot(x, params['w1']) + params['b1'], 0.0)
    mlp = jnp.dot(h, params['w2']) + params['b2']
    x = _layernorm(x + mlp, params['n2_w'], params['n2_b'])
    return x.reshape(B, S, D)


if __name__ == "__main__":
    B, S, D, H = 2, 8, 32, 4   # batch, seq, d_model, nhead (head_dim = 8)

    key = jax.random.PRNGKey(0)
    k_a, k_b, k_p = jax.random.split(key, 3)
    alpha = jax.random.normal(k_a, (B, S, D), dtype=jnp.float32)
    beta = jax.random.normal(k_b, (B, S, D), dtype=jnp.float32)
    params = make_params(D, k_p)
    pe = make_pe(D)

    out = cmaf_layer(alpha, beta, params, pe, nhead=H)
    out = jax.block_until_ready(out)

    ref = cmaf_reference(alpha, beta, params, pe, nhead=H)
    assert out.shape == (B, S, D)
    # Softmax normalisation is now exact, so kernel vs. reference only differ
    # by matmul fusion / accumulation order; 5e-3 gives comfortable margin for
    # the TPU's default f32-via-bf16 matmul precision.
    np.testing.assert_allclose(np.asarray(out), np.asarray(ref),
                               atol=5e-3, rtol=5e-3)
    print("KERNEL_OK")
</pallas_src>

<mosaic_0001>
module attributes {stable_mosaic.version = 11 : i64} {
  func.func @cmaf_kernel(%arg0: memref<2x8x32xf32, #tpu.memory_space<vmem>>, %arg1: memref<2x8x32xf32, #tpu.memory_space<vmem>>, %arg2: memref<8x32xf32, #tpu.memory_space<vmem>>, %arg3: memref<66x128xf32, #tpu.memory_space<vmem>>, %arg4: memref<33x64xf32, #tpu.memory_space<vmem>>, %arg5: memref<198x32xf32, #tpu.memory_space<vmem>>, %arg6: memref<16x32xf32, #tpu.memory_space<vmem>>) attributes {dimension_semantics = [], scalar_prefetch = 0 : i64, scratch_operands = 0 : i64, tpu.core_type = #tpu.core_type<tc>} {
    %c0 = arith.constant 0 : index
    %c0_0 = arith.constant 0 : index
    %0 = vector.load %arg2[%c0, %c0_0] : memref<8x32xf32, #tpu.memory_space<vmem>>, vector<8x32xf32>
    %c0_1 = arith.constant 0 : index
    %c0_2 = arith.constant 0 : index
    %c0_3 = arith.constant 0 : index
    %1 = vector.load %arg0[%c0_1, %c0_2, %c0_3] : memref<2x8x32xf32, #tpu.memory_space<vmem>>, vector<2x8x32xf32>
    %2 = vector.shape_cast %0 : vector<8x32xf32> to vector<1x8x32xf32>
    %3 = vector.broadcast %2 : vector<1x8x32xf32> to vector<2x8x32xf32>
    %4 = arith.addf %1, %3 : vector<2x8x32xf32>
    %5 = vector.shape_cast %4 : vector<2x8x32xf32> to vector<16x32xf32>
    %c0_4 = arith.constant 0 : index
    %c0_5 = arith.constant 0 : index
    %c0_6 = arith.constant 0 : index
    %6 = vector.load %arg1[%c0_4, %c0_5, %c0_6] : memref<2x8x32xf32, #tpu.memory_space<vmem>>, vector<2x8x32xf32>
    %7 = vector.shape_cast %0 : vector<8x32xf32> to vector<1x8x32xf32>
    %8 = vector.broadcast %7 : vector<1x8x32xf32> to vector<2x8x32xf32>
    %9 = arith.addf %6, %8 : vector<2x8x32xf32>
    %10 = vector.shape_cast %9 : vector<2x8x32xf32> to vector<16x32xf32>
    %c0_7 = arith.constant 0 : index
    %c0_8 = arith.constant 0 : index
    %11 = vector.load %arg3[%c0_7, %c0_8] : memref<66x128xf32, #tpu.memory_space<vmem>>, vector<32x128xf32>
    %c32 = arith.constant 32 : index
    %c0_9 = arith.constant 0 : index
    %12 = vector.load %arg3[%c32, %c0_9] : memref<66x128xf32, #tpu.memory_space<vmem>>, vector<32x128xf32>
    %c64 = arith.constant 64 : index
    %c0_10 = arith.constant 0 : index
    %13 = vector.load %arg3[%c64, %c0_10] : memref<66x128xf32, #tpu.memory_space<vmem>>, vector<2x128xf32>
    %14 = vector.extract_strided_slice %13 {offsets = [0, 0], sizes = [1, 128], strides = [1, 1]} : vector<2x128xf32> to vector<1x128xf32>
    %15 = vector.extract_strided_slice %13 {offsets = [1, 0], sizes = [1, 128], strides = [1, 1]} : vector<2x128xf32> to vector<1x128xf32>
    %c0_11 = arith.constant 0 : index
    %c0_12 = arith.constant 0 : index
    %16 = vector.load %arg4[%c0_11, %c0_12] : memref<33x64xf32, #tpu.memory_space<vmem>>, vector<32x64xf32>
    %c32_13 = arith.constant 32 : index
    %c0_14 = arith.constant 0 : index
    %17 = vector.load %arg4[%c32_13, %c0_14] : memref<33x64xf32, #tpu.memory_space<vmem>>, vector<1x64xf32>
    %c0_15 = arith.constant 0 : index
    %c0_16 = arith.constant 0 : index
    %18 = vector.load %arg5[%c0_15, %c0_16] : memref<198x32xf32, #tpu.memory_space<vmem>>, vector<128x32xf32>
    %c128 = arith.constant 128 : index
    %c0_17 = arith.constant 0 : index
    %19 = vector.load %arg5[%c128, %c0_17] : memref<198x32xf32, #tpu.memory_space<vmem>>, vector<64x32xf32>
    %c192 = arith.constant 192 : index
    %c0_18 = arith.constant 0 : index
    %20 = vector.load %arg5[%c192, %c0_18] : memref<198x32xf32, #tpu.memory_space<vmem>>, vector<6x32xf32>
    %21 = vector.extract_strided_slice %20 {offsets = [0, 0], sizes = [1, 32], strides = [1, 1]} : vector<6x32xf32> to vector<1x32xf32>
    %22 = vector.extract_strided_slice %20 {offsets = [1, 0], sizes = [1, 32], strides = [1, 1]} : vector<6x32xf32> to vector<1x32xf32>
    %23 = vector.extract_strided_slice %20 {offsets = [2, 0], sizes = [1, 32], strides = [1, 1]} : vector<6x32xf32> to vector<1x32xf32>
    %24 = vector.extract_strided_slice %20 {offsets = [3, 0], sizes = [1, 32], strides = [1, 1]} : vector<6x32xf32> to vector<1x32xf32>
    %25 = vector.extract_strided_slice %20 {offsets = [4, 0], sizes = [1, 32], strides = [1, 1]} : vector<6x32xf32> to vector<1x32xf32>
    %26 = vector.extract_strided_slice %20 {offsets = [5, 0], sizes = [1, 32], strides = [1, 1]} : vector<6x32xf32> to vector<1x32xf32>
    %cst = arith.constant dense<0.000000e+00> : vector<16x128xf32>
    %27 = tpu.matmul %5, %11, %cst {dimension_numbers = #tpu.dot_dimension_numbers<[1], [0], [0], [1], [0, 0, 1, 1], [], []>} : vector<16x32xf32>, vector<32x128xf32>, vector<16x128xf32> -> vector<16x128xf32>
    %28 = vector.broadcast %14 : vector<1x128xf32> to vector<16x128xf32>
    %29 = arith.addf %27, %28 : vector<16x128xf32>
    %cst_19 = arith.constant dense<0.000000e+00> : vector<16x64xf32>
    %30 = tpu.matmul %10, %16, %cst_19 {dimension_numbers = #tpu.dot_dimension_numbers<[1], [0], [0], [1], [0, 0, 1, 1], [], []>} : vector<16x32xf32>, vector<32x64xf32>, vector<16x64xf32> -> vector<16x64xf32>
    %31 = vector.broadcast %17 : vector<1x64xf32> to vector<16x64xf32>
    %32 = arith.addf %30, %31 : vector<16x64xf32>
    %33 = vector.extract_strided_slice %29 {offsets = [0, 0], sizes = [16, 8], strides = [1, 1]} : vector<16x128xf32> to vector<16x8xf32>
    %34 = vector.shape_cast %33 : vector<16x8xf32> to vector<2x1x8x8xf32>
    %35 = vector.extract_strided_slice %29 {offsets = [0, 8], sizes = [16, 8], strides = [1, 1]} : vector<16x128xf32> to vector<16x8xf32>
    %36 = vector.shape_cast %35 : vector<16x8xf32> to vector<2x1x8x8xf32>
    %37 = vector.extract_strided_slice %29 {offsets = [0, 16], sizes = [16, 8], strides = [1, 1]} : vector<16x128xf32> to vector<16x8xf32>
    %38 = vector.shape_cast %37 : vector<16x8xf32> to vector<2x1x8x8xf32>
    %39 = vector.extract_strided_slice %29 {offsets = [0, 24], sizes = [16, 8], strides = [1, 1]} : vector<16x128xf32> to vector<16x8xf32>
    %40 = vector.shape_cast %39 : vector<16x8xf32> to vector<2x1x8x8xf32>
    %41 = tpu.concatenate %34, %36, %38, %40 in 1 : vector<2x1x8x8xf32>, vector<2x1x8x8xf32>, vector<2x1x8x8xf32>, vector<2x1x8x8xf32> -> vector<2x4x8x8xf32>
    %42 = vector.shape_cast %41 : vector<2x4x8x8xf32> to vector<8x8x8xf32>
    %cst_20 = arith.constant 0.353553385 : f32
    %43 = vector.broadcast %cst_20 : f32 to vector<8x8x8xf32>
    %44 = arith.mulf %42, %43 : vector<8x8x8xf32>
    %45 = vector.extract_strided_slice %29 {offsets = [0, 32], sizes = [16, 8], strides = [1, 1]} : vector<16x128xf32> to vector<16x8xf32>
    %46 = vector.shape_cast %45 : vector<16x8xf32> to vector<2x1x8x8xf32>
    %47 = vector.extract_strided_slice %29 {offsets = [0, 40], sizes = [16, 8], strides = [1, 1]} : vector<16x128xf32> to vector<16x8xf32>
    %48 = vector.shape_cast %47 : vector<16x8xf32> to vector<2x1x8x8xf32>
    %49 = vector.extract_strided_slice %29 {offsets = [0, 48], sizes = [16, 8], strides = [1, 1]} : vector<16x128xf32> to vector<16x8xf32>
    %50 = vector.shape_cast %49 : vector<16x8xf32> to vector<2x1x8x8xf32>
    %51 = vector.extract_strided_slice %29 {offsets = [0, 56], sizes = [16, 8], strides = [1, 1]} : vector<16x128xf32> to vector<16x8xf32>
    %52 = vector.shape_cast %51 : vector<16x8xf32> to vector<2x1x8x8xf32>
    %53 = tpu.concatenate %46, %48, %50, %52 in 1 : vector<2x1x8x8xf32>, vector<2x1x8x8xf32>, vector<2x1x8x8xf32>, vector<2x1x8x8xf32> -> vector<2x4x8x8xf32>
    %54 = vector.shape_cast %53 : vector<2x4x8x8xf32> to vector<8x8x8xf32>
    %55 = vector.extract_strided_slice %29 {offsets = [0, 64], sizes = [16, 8], strides = [1, 1]} : vector<16x128xf32> to vector<16x8xf32>
    %56 = vector.shape_cast %55 : vector<16x8xf32> to vector<2x1x8x8xf32>
    %57 = vector.extract_strided_slice %29 {offsets = [0, 72], sizes = [16, 8], strides = [1, 1]} : vector<16x128xf32> to vector<16x8xf32>
    %58 = vector.shape_cast %57 : vector<16x8xf32> to vector<2x1x8x8xf32>
    %59 = vector.extract_strided_slice %29 {offsets = [0, 80], sizes = [16, 8], strides = [1, 1]} : vector<16x128xf32> to vector<16x8xf32>
    %60 = vector.shape_cast %59 : vector<16x8xf32> to vector<2x1x8x8xf32>
    %61 = vector.extract_strided_slice %29 {offsets = [0, 88], sizes = [16, 8], strides = [1, 1]} : vector<16x128xf32> to vector<16x8xf32>
    %62 = vector.shape_cast %61 : vector<16x8xf32> to vector<2x1x8x8xf32>
    %63 = tpu.concatenate %56, %58, %60, %62 in 1 : vector<2x1x8x8xf32>, vector<2x1x8x8xf32>, vector<2x1x8x8xf32>, vector<2x1x8x8xf32> -> vector<2x4x8x8xf32>
    %64 = vector.shape_cast %63 : vector<2x4x8x8xf32> to vector<8x8x8xf32>
    "tpu.trace_start"() <{level = 10 : i32, message = "bqd,bkd->bqk"}> : () -> ()
    %cst_21 = arith.constant dense<0.000000e+00> : vector<8x8x8xf32>
    %65 = tpu.matmul %44, %54, %cst_21 {dimension_numbers = #tpu.dot_dimension_numbers<[2], [2], [1], [1], [0, 0, 0, 1, 1, 1], [0], [0]>} : vector<8x8x8xf32>, vector<8x8x8xf32>, vector<8x8x8xf32> -> vector<8x8x8xf32>
    "tpu.trace_stop"() : () -> ()
    %cst_22 = arith.constant dense<0xFF800000> : vector<8x8xf32>
    %66 = vector.multi_reduction <maximumf>, %65, %cst_22 [2] : vector<8x8x8xf32> to vector<8x8xf32>
    %67 = vector.shape_cast %66 : vector<8x8xf32> to vector<8x8x1xf32>
    %68 = vector.broadcast %67 : vector<8x8x1xf32> to vector<8x8x8xf32>
    %69 = arith.subf %65, %68 : vector<8x8x8xf32>
    %70 = math.exp %69 : vector<8x8x8xf32>
    %cst_23 = arith.constant dense<0.000000e+00> : vector<8x8xf32>
    %71 = vector.multi_reduction <add>, %70, %cst_23 [2] : vector<8x8x8xf32> to vector<8x8xf32>
    %72 = vector.shape_cast %71 : vector<8x8xf32> to vector<8x8x1xf32>
    %73 = vector.broadcast %72 : vector<8x8x1xf32> to vector<8x8x8xf32>
    %74 = arith.divf %70, %73 : vector<8x8x8xf32>
    "tpu.trace_start"() <{level = 10 : i32, message = "bqk,bkd->bqd"}> : () -> ()
    %cst_24 = arith.constant dense<0.000000e+00> : vector<8x8x8xf32>
    %75 = tpu.matmul %74, %64, %cst_24 {dimension_numbers = #tpu.dot_dimension_numbers<[2], [1], [1], [2], [0, 0, 0, 1, 1, 2], [0], [0]>} : vector<8x8x8xf32>, vector<8x8x8xf32>, vector<8x8x8xf32> -> vector<8x8x8xf32>
    "tpu.trace_stop"() : () -> ()
    %76 = vector.shape_cast %75 : vector<8x8x8xf32> to vector<2x4x8x8xf32>
    %77 = vector.extract_strided_slice %76 {offsets = [0, 0, 0, 0], sizes = [2, 1, 8, 8], strides = [1, 1, 1, 1]} : vector<2x4x8x8xf32> to vector<2x1x8x8xf32>
    %78 = vector.shape_cast %77 : vector<2x1x8x8xf32> to vector<2x8x8xf32>
    %79 = vector.extract_strided_slice %76 {offsets = [0, 1, 0, 0], sizes = [2, 1, 8, 8], strides = [1, 1, 1, 1]} : vector<2x4x8x8xf32> to vector<2x1x8x8xf32>
    %80 = vector.shape_cast %79 : vector<2x1x8x8xf32> to vector<2x8x8xf32>
    %81 = vector.extract_strided_slice %76 {offsets = [0, 2, 0, 0], sizes = [2, 1, 8, 8], strides = [1, 1, 1, 1]} : vector<2x4x8x8xf32> to vector<2x1x8x8xf32>
    %82 = vector.shape_cast %81 : vector<2x1x8x8xf32> to vector<2x8x8xf32>
    %83 = vector.extract_strided_slice %76 {offsets = [0, 3, 0, 0], sizes = [2, 1, 8, 8], strides = [1, 1, 1, 1]} : vector<2x4x8x8xf32> to vector<2x1x8x8xf32>
    %84 = vector.shape_cast %83 : vector<2x1x8x8xf32> to vector<2x8x8xf32>
    %85 = tpu.concatenate %78, %80, %82, %84 in 2 : vector<2x8x8xf32>, vector<2x8x8xf32>, vector<2x8x8xf32>, vector<2x8x8xf32> -> vector<2x8x32xf32>
    %86 = vector.shape_cast %85 : vector<2x8x32xf32> to vector<16x32xf32>
    %87 = vector.extract_strided_slice %29 {offsets = [0, 96], sizes = [16, 8], strides = [1, 1]} : vector<16x128xf32> to vector<16x8xf32>
    %88 = vector.shape_cast %87 : vector<16x8xf32> to vector<2x1x8x8xf32>
    %89 = vector.extract_strided_slice %29 {offsets = [0, 104], sizes = [16, 8], strides = [1, 1]} : vector<16x128xf32> to vector<16x8xf32>
    %90 = vector.shape_cast %89 : vector<16x8xf32> to vector<2x1x8x8xf32>
    %91 = vector.extract_strided_slice %29 {offsets = [0, 112], sizes = [16, 8], strides = [1, 1]} : vector<16x128xf32> to vector<16x8xf32>
    %92 = vector.shape_cast %91 : vector<16x8xf32> to vector<2x1x8x8xf32>
    %93 = vector.extract_strided_slice %29 {offsets = [0, 120], sizes = [16, 8], strides = [1, 1]} : vector<16x128xf32> to vector<16x8xf32>
    %94 = vector.shape_cast %93 : vector<16x8xf32> to vector<2x1x8x8xf32>
    %95 = tpu.concatenate %88, %90, %92, %94 in 1 : vector<2x1x8x8xf32>, vector<2x1x8x8xf32>, vector<2x1x8x8xf32>, vector<2x1x8x8xf32> -> vector<2x4x8x8xf32>
    %96 = vector.shape_cast %95 : vector<2x4x8x8xf32> to vector<8x8x8xf32>
    %cst_25 = arith.constant 0.353553385 : f32
    %97 = vector.broadcast %cst_25 : f32 to vector<8x8x8xf32>
    %98 = arith.mulf %96, %97 : vector<8x8x8xf32>
    %99 = vector.extract_strided_slice %32 {offsets = [0, 0], sizes = [16, 8], strides = [1, 1]} : vector<16x64xf32> to vector<16x8xf32>
    %100 = vector.shape_cast %99 : vector<16x8xf32> to vector<2x1x8x8xf32>
    %101 = vector.extract_strided_slice %32 {offsets = [0, 8], sizes = [16, 8], strides = [1, 1]} : vector<16x64xf32> to vector<16x8xf32>
    %102 = vector.shape_cast %101 : vector<16x8xf32> to vector<2x1x8x8xf32>
    %103 = vector.extract_strided_slice %32 {offsets = [0, 16], sizes = [16, 8], strides = [1, 1]} : vector<16x64xf32> to vector<16x8xf32>
    %104 = vector.shape_cast %103 : vector<16x8xf32> to vector<2x1x8x8xf32>
    %105 = vector.extract_strided_slice %32 {offsets = [0, 24], sizes = [16, 8], strides = [1, 1]} : vector<16x64xf32> to vector<16x8xf32>
    %106 = vector.shape_cast %105 : vector<16x8xf32> to vector<2x1x8x8xf32>
    %107 = tpu.concatenate %100, %102, %104, %106 in 1 : vector<2x1x8x8xf32>, vector<2x1x8x8xf32>, vector<2x1x8x8xf32>, vector<2x1x8x8xf32> -> vector<2x4x8x8xf32>
    %108 = vector.shape_cast %107 : vector<2x4x8x8xf32> to vector<8x8x8xf32>
    %109 = vector.extract_strided_slice %32 {offsets = [0, 32], sizes = [16, 8], strides = [1, 1]} : vector<16x64xf32> to vector<16x8xf32>
    %110 = vector.shape_cast %109 : vector<16x8xf32> to vector<2x1x8x8xf32>
    %111 = vector.extract_strided_slice %32 {offsets = [0, 40], sizes = [16, 8], strides = [1, 1]} : vector<16x64xf32> to vector<16x8xf32>
    %112 = vector.shape_cast %111 : vector<16x8xf32> to vector<2x1x8x8xf32>
    %113 = vector.extract_strided_slice %32 {offsets = [0, 48], sizes = [16, 8], strides = [1, 1]} : vector<16x64xf32> to vector<16x8xf32>
    %114 = vector.shape_cast %113 : vector<16x8xf32> to vector<2x1x8x8xf32>
    %115 = vector.extract_strided_slice %32 {offsets = [0, 56], sizes = [16, 8], strides = [1, 1]} : vector<16x64xf32> to vector<16x8xf32>
    %116 = vector.shape_cast %115 : vector<16x8xf32> to vector<2x1x8x8xf32>
    %117 = tpu.concatenate %110, %112, %114, %116 in 1 : vector<2x1x8x8xf32>, vector<2x1x8x8xf32>, vector<2x1x8x8xf32>, vector<2x1x8x8xf32> -> vector<2x4x8x8xf32>
    %118 = vector.shape_cast %117 : vector<2x4x8x8xf32> to vector<8x8x8xf32>
    "tpu.trace_start"() <{level = 10 : i32, message = "bqd,bkd->bqk"}> : () -> ()
    %cst_26 = arith.constant dense<0.000000e+00> : vector<8x8x8xf32>
    %119 = tpu.matmul %98, %108, %cst_26 {dimension_numbers = #tpu.dot_dimension_numbers<[2], [2], [1], [1], [0, 0, 0, 1, 1, 1], [0], [0]>} : vector<8x8x8xf32>, vector<8x8x8xf32>, vector<8x8x8xf32> -> vector<8x8x8xf32>
    "tpu.trace_stop"() : () -> ()
    %cst_27 = arith.constant dense<0xFF800000> : vector<8x8xf32>
    %120 = vector.multi_reduction <maximumf>, %119, %cst_27 [2] : vector<8x8x8xf32> to vector<8x8xf32>
    %121 = vector.shape_cast %120 : vector<8x8xf32> to vector<8x8x1xf32>
    %122 = vector.broadcast %121 : vector<8x8x1xf32> to vector<8x8x8xf32>
    %123 = arith.subf %119, %122 : vector<8x8x8xf32>
    %124 = math.exp %123 : vector<8x8x8xf32>
    %cst_28 = arith.constant dense<0.000000e+00> : vector<8x8xf32>
    %125 = vector.multi_reduction <add>, %124, %cst_28 [2] : vector<8x8x8xf32> to vector<8x8xf32>
    %126 = vector.shape_cast %125 : vector<8x8xf32> to vector<8x8x1xf32>
    %127 = vector.broadcast %126 : vector<8x8x1xf32> to vector<8x8x8xf32>
    %128 = arith.divf %124, %127 : vector<8x8x8xf32>
    "tpu.trace_start"() <{level = 10 : i32, message = "bqk,bkd->bqd"}> : () -> ()
    %cst_29 = arith.constant dense<0.000000e+00> : vector<8x8x8xf32>
    %129 = tpu.matmul %128, %118, %cst_29 {dimension_numbers = #tpu.dot_dimension_numbers<[2], [1], [1], [2], [0, 0, 0, 1, 1, 2], [0], [0]>} : vector<8x8x8xf32>, vector<8x8x8xf32>, vector<8x8x8xf32> -> vector<8x8x8xf32>
    "tpu.trace_stop"() : () -> ()
    %130 = vector.shape_cast %129 : vector<8x8x8xf32> to vector<2x4x8x8xf32>
    %131 = vector.extract_strided_slice %130 {offsets = [0, 0, 0, 0], sizes = [2, 1, 8, 8], strides = [1, 1, 1, 1]} : vector<2x4x8x8xf32> to vector<2x1x8x8xf32>
    %132 = vector.shape_cast %131 : vector<2x1x8x8xf32> to vector<2x8x8xf32>
    %133 = vector.extract_strided_slice %130 {offsets = [0, 1, 0, 0], sizes = [2, 1, 8, 8], strides = [1, 1, 1, 1]} : vector<2x4x8x8xf32> to vector<2x1x8x8xf32>
    %134 = vector.shape_cast %133 : vector<2x1x8x8xf32> to vector<2x8x8xf32>
    %135 = vector.extract_strided_slice %130 {offsets = [0, 2, 0, 0], sizes = [2, 1, 8, 8], strides = [1, 1, 1, 1]} : vector<2x4x8x8xf32> to vector<2x1x8x8xf32>
    %136 = vector.shape_cast %135 : vector<2x1x8x8xf32> to vector<2x8x8xf32>
    %137 = vector.extract_strided_slice %130 {offsets = [0, 3, 0, 0], sizes = [2, 1, 8, 8], strides = [1, 1, 1, 1]} : vector<2x4x8x8xf32> to vector<2x1x8x8xf32>
    %138 = vector.shape_cast %137 : vector<2x1x8x8xf32> to vector<2x8x8xf32>
    %139 = tpu.concatenate %132, %134, %136, %138 in 2 : vector<2x8x8xf32>, vector<2x8x8xf32>, vector<2x8x8xf32>, vector<2x8x8xf32> -> vector<2x8x32xf32>
    %140 = vector.shape_cast %139 : vector<2x8x32xf32> to vector<16x32xf32>
    %141 = tpu.concatenate %86, %140 in 1 : vector<16x32xf32>, vector<16x32xf32> -> vector<16x64xf32>
    %cst_30 = arith.constant dense<0.000000e+00> : vector<16x32xf32>
    %142 = tpu.matmul %141, %19, %cst_30 {dimension_numbers = #tpu.dot_dimension_numbers<[1], [0], [0], [1], [0, 0, 1, 1], [], []>} : vector<16x64xf32>, vector<64x32xf32>, vector<16x32xf32> -> vector<16x32xf32>
    %143 = vector.broadcast %21 : vector<1x32xf32> to vector<16x32xf32>
    %144 = arith.addf %142, %143 : vector<16x32xf32>
    %145 = arith.addf %5, %144 : vector<16x32xf32>
    %cst_31 = arith.constant dense<0.000000e+00> : vector<16xf32>
    %146 = vector.multi_reduction <add>, %145, %cst_31 [1] : vector<16x32xf32> to vector<16xf32>
    %147 = vector.shape_cast %146 : vector<16xf32> to vector<16x1xf32>
    %cst_32 = arith.constant 3.200000e+01 : f32
    %148 = vector.broadcast %cst_32 : f32 to vector<16x1xf32>
    %149 = arith.divf %147, %148 : vector<16x1xf32>
    %150 = vector.broadcast %149 : vector<16x1xf32> to vector<16x32xf32>
    %151 = arith.subf %145, %150 : vector<16x32xf32>
    %152 = arith.mulf %151, %151 : vector<16x32xf32>
    %cst_33 = arith.constant dense<0.000000e+00> : vector<16xf32>
    %153 = vector.multi_reduction <add>, %152, %cst_33 [1] : vector<16x32xf32> to vector<16xf32>
    %154 = vector.shape_cast %153 : vector<16xf32> to vector<16x1xf32>
    %cst_34 = arith.constant 3.200000e+01 : f32
    %155 = vector.broadcast %cst_34 : f32 to vector<16x1xf32>
    %156 = arith.divf %154, %155 : vector<16x1xf32>
    %cst_35 = arith.constant 9.99999974E-6 : f32
    %157 = vector.broadcast %cst_35 : f32 to vector<16x1xf32>
    %158 = arith.addf %156, %157 : vector<16x1xf32>
    %159 = math.rsqrt %158 : vector<16x1xf32>
    %160 = vector.broadcast %159 : vector<16x1xf32> to vector<16x32xf32>
    %161 = arith.mulf %151, %160 : vector<16x32xf32>
    %162 = vector.broadcast %23 : vector<1x32xf32> to vector<16x32xf32>
    %163 = arith.mulf %161, %162 : vector<16x32xf32>
    %164 = vector.broadcast %24 : vector<1x32xf32> to vector<16x32xf32>
    %165 = arith.addf %163, %164 : vector<16x32xf32>
    %cst_36 = arith.constant dense<0.000000e+00> : vector<16x128xf32>
    %166 = tpu.matmul %165, %12, %cst_36 {dimension_numbers = #tpu.dot_dimension_numbers<[1], [0], [0], [1], [0, 0, 1, 1], [], []>} : vector<16x32xf32>, vector<32x128xf32>, vector<16x128xf32> -> vector<16x128xf32>
    %167 = vector.broadcast %15 : vector<1x128xf32> to vector<16x128xf32>
    %168 = arith.addf %166, %167 : vector<16x128xf32>
    %cst_37 = arith.constant 0.000000e+00 : f32
    %169 = vector.broadcast %cst_37 : f32 to vector<16x128xf32>
    %170 = arith.maximumf %168, %169 : vector<16x128xf32>
    %cst_38 = arith.constant dense<0.000000e+00> : vector<16x32xf32>
    %171 = tpu.matmul %170, %18, %cst_38 {dimension_numbers = #tpu.dot_dimension_numbers<[1], [0], [0], [1], [0, 0, 1, 1], [], []>} : vector<16x128xf32>, vector<128x32xf32>, vector<16x32xf32> -> vector<16x32xf32>
    %172 = vector.broadcast %22 : vector<1x32xf32> to vector<16x32xf32>
    %173 = arith.addf %171, %172 : vector<16x32xf32>
    %174 = arith.addf %165, %173 : vector<16x32xf32>
    %cst_39 = arith.constant dense<0.000000e+00> : vector<16xf32>
    %175 = vector.multi_reduction <add>, %174, %cst_39 [1] : vector<16x32xf32> to vector<16xf32>
    %176 = vector.shape_cast %175 : vector<16xf32> to vector<16x1xf32>
    %cst_40 = arith.constant 3.200000e+01 : f32
    %177 = vector.broadcast %cst_40 : f32 to vector<16x1xf32>
    %178 = arith.divf %176, %177 : vector<16x1xf32>
    %179 = vector.broadcast %178 : vector<16x1xf32> to vector<16x32xf32>
    %180 = arith.subf %174, %179 : vector<16x32xf32>
    %181 = arith.mulf %180, %180 : vector<16x32xf32>
    %cst_41 = arith.constant dense<0.000000e+00> : vector<16xf32>
    %182 = vector.multi_reduction <add>, %181, %cst_41 [1] : vector<16x32xf32> to vector<16xf32>
    %183 = vector.shape_cast %182 : vector<16xf32> to vector<16x1xf32>
    %cst_42 = arith.constant 3.200000e+01 : f32
    %184 = vector.broadcast %cst_42 : f32 to vector<16x1xf32>
    %185 = arith.divf %183, %184 : vector<16x1xf32>
    %cst_43 = arith.constant 9.99999974E-6 : f32
    %186 = vector.broadcast %cst_43 : f32 to vector<16x1xf32>
    %187 = arith.addf %185, %186 : vector<16x1xf32>
    %188 = math.rsqrt %187 : vector<16x1xf32>
    %189 = vector.broadcast %188 : vector<16x1xf32> to vector<16x32xf32>
    %190 = arith.mulf %180, %189 : vector<16x32xf32>
    %191 = vector.broadcast %25 : vector<1x32xf32> to vector<16x32xf32>
    %192 = arith.mulf %190, %191 : vector<16x32xf32>
    %193 = vector.broadcast %26 : vector<1x32xf32> to vector<16x32xf32>
    %194 = arith.addf %192, %193 : vector<16x32xf32>
    %c0_44 = arith.constant 0 : index
    %c0_45 = arith.constant 0 : index
    %195 = vector.load %arg6[%c0_44, %c0_45] : memref<16x32xf32, #tpu.memory_space<vmem>>, vector<16x32xf32>
    tpu.vector_store %arg6[%c0_44, %c0_45], %194 {strides = array<i32>} : memref<16x32xf32, #tpu.memory_space<vmem>>, vector<16x32xf32>,
    return
  }
}

</mosaic_0001>

<bundles_post_ra>
// kernel: tpu_custom_call.1
= control target key start
LH: loop header
LB: loop body
LE: loop exit
PB: predicated region body
PF: predicated region fallthrough
CT: control target
= control target key end

     0   :  { %vm76_vm0 = vcmask 261120   ;;  %s4556_s0 = inlined_call_operand.vmem [shape: f32[2,8,32], index: 0, kind: input, shape index: {}]   ;;  %s4557_s1 = inlined_call_operand.vmem [shape: f32[2,8,32], index: 1, kind: input, shape index: {}]   ;;  %s4558_s2 = inlined_call_operand.vmem [shape: f32[8,32], index: 2, kind: input, shape index: {}]   ;;  %s4559_s3 = inlined_call_operand.vmem [shape: f32[66,128], index: 3, kind: input, shape index: {}]   ;;  %s4560_s4 = inlined_call_operand.vmem [shape: f32[33,64], index: 4, kind: input, shape index: {}]   ;;  %s4561_s5 = inlined_call_operand.vmem [shape: f32[198,32], index: 5, kind: input, shape index: {}]   ;;  %s4562_s6 = inlined_call_operand.hbm [shape: f32[16,32], index: 6, kind: output, shape index: {}]  }
   0x1   :  { %v33_v0 = vld [vmem:[%s4559_s3] sm:$0xff]  ;;  %v34_v1 = vld [vmem:[%s4559_s3 + $0x8] sm:$0xff]  ;;  %v35_v2 = vld [vmem:[%s4559_s3 + $0x10] sm:$0xff] }
   0x2   :  { %v3739_v3 = vpack.c.bf16 %v34_v1, %v33_v0  ;;  %v36_v4 = vld [vmem:[%s4559_s3 + $0x18] sm:$0xff]  ;;  %v24_v5 = vld [vmem:[%s4558_s2] sm:$0xff]  ;;  %v43_v10 = vld [vmem:[%s4560_s4 + $0x8] sm:$0xff] }
   0x3   :  { %v25_v6 = vld [vmem:[%s4556_s0] sm:$0xff]  ;;  %v3743_v7 = vpack.c.bf16 %v36_v4, %v35_v2  ;;  %v26_v11 = vld [vmem:[%s4556_s0 + $0x8] sm:$0xff] }
   0x4   :  { %v3987_v8 = vadd.f32 %v25_v6, %v24_v5  ;;  %v42_v9 = vld [vmem:[%s4560_s4] sm:$0xff]  ;;  %3740 = vmatprep.subr.bf16.mxu0 %v3739_v3 }
   0x5   :  { %3742 = vmatpush3.bf16.msra.mxu0 %v3739_v3 }
   0x6   :  { %3500 = vmatprep.mubr.msk.f32.mxu0 %vm76_vm0, %v3987_v8 }
   0x7   :  { %11 = vsyncpa [#allocation3], 0  ;;  %3744 = vmatprep.subr.bf16.mxu0 %v3743_v7  ;;  %v3747_v12 = vpack.c.bf16 %v43_v10, %v42_v9  ;;  %v29_v13 = vld [vmem:[%s4557_s1] sm:$0xff]  ;;  %v44_v14 = vld [vmem:[%s4560_s4 + $0x10] sm:$0xff]  ;;  %v4009_v16 = vadd.f32 %v26_v11, %v24_v5  ;;  %v72_v21 = vlaneseq  ;;  %v3921_v27 = vmov 0.0   ;;  %s3923_s23 = smov 120  }
   0x8   :  { %v45_v15 = vld [vmem:[%s4560_s4 + $0x18] sm:$0xff]  ;;  %v31_v17 = vadd.f32 %v29_v13, %v24_v5  ;;  %v30_v19 = vld [vmem:[%s4557_s1 + $0x8] sm:$0xff]  ;;  %v41_v24 = vld [vmem:[%s4559_s3 + $0x40] sm:$0x3]  ;;  %3529 = vmatprep.subr.mxu1 %v3921_v27  ;;  %s3922_s1 = smov 104   ;;  %vm3924_vm1 = vmmov 0  }
   0x9   :  { %3746 = vmatpush3.bf16.msra.mxu0 %v3743_v7  ;;  %v3751_v18 = vpack.c.bf16 %v45_v15, %v44_v14  ;;  %v32_v20 = vadd.f32 %v30_v19, %v24_v5  ;;  %v4018_v22 = vshrl.u32 %v72_v21, 7  ;;  %3531 = vmatprep.mubr.msk.f32.mxu1 %vm3924_vm1, %v3921_v27  ;;  %s3925_s24 = smov 112   ;;  %v3327_v32 = vld [vmem:[%s4560_s4 + $0x20] ss:$0 sm:$0xff]  ;;  %s3926_s27 = smov 96   ;;  %vm273_vm2 = vcmask 64512  }
   0xa   :  { %3748 = vmatprep.subr.bf16.mxu0 %v3747_v12  ;;  %s3927_s4 = smov 64   ;;  %s3928_s28 = smov 32   ;;  %vm1610_vm3 = vcmask 130048   ;;  %vm1613_vm4 = vcmask 195584   ;;  %vm2978_vm5 = vcmask 523264  }
   0xb   :  { %v74_v23 = vsub.s32 0, %v4018_v22  ;;  %s3929_s29 = smov 8   ;;  %s3930_s30 = smov 16  }
   0xc   :  { %3501 = vmatmul.mubr.msk.f32.vlgmr.msra.gmra.mrb[0].mxu0 %vm76_vm0, %v4009_v16  ;;  %s3931_s7 = smov 24  }
   0xd   :  { %3750 = vmatpush3.bf16.msra.mxu0 %v3747_v12  ;;  %3511 = vmatprep.mubr.msk.f32.mxu0 %vm76_vm0, %v31_v17  ;;  %v75_v25 = vrot.slane %v41_v24, %v74_v23 }
   0xe   :  { %3752 = vmatprep.subr.bf16.mxu0 %v3751_v18 }
  0x11   :  { %3754 = vmatpush3.bf16.msra.mxu0 %v3751_v18 }
  0x12   :  { %3514 = vmatprep.subr.mxu0 %v3921_v27 }
  0x14   :  { %3512 = vmatmul.mubr.msk.f32.vlgmr.msra.gmra.mrb[2].mxu0 %vm76_vm0, %v32_v20 }
  0x15   :  { %3516 = vmatprep.mubr.msk.f32.mxu0 %vm3924_vm1, %v3921_v27 }
  0xdf   :  { %v3502_v26 = vpop.f32.mrb[0].mxu0 }
  0xe0   :  { %v149_v28 = vpop.f32.mrb[1].mxu0  ;;  %v4034_v30 = vadd.f32 %v3502_v26, %v75_v25 }
  0xe1   :  { %v150_v29 = vadd.f32 %v149_v28, %v75_v25 }
  0xe2   :  { %v4097_v53 = vmul.f32 0.35355338, %v4034_v30 }
  0xe3   :  { %257 = vrot.lane.b32.xlu1 %v150_v29, %s3922_s1  ;;  %245 = vrot.lane.b32.xlu0 %v150_v29, %s3923_s23  ;;  %v263_v42 = vmul.f32 0.35355338, %v150_v29 }
  0xe7   :  { %247 = vrot.lane.b32.xlu1 %v4034_v30, %s3923_s23  ;;  %251 = vrot.lane.b32.xlu0 %v150_v29, %s3925_s24  ;;  %v3513_v31 = vpop.f32.mrb[2].mxu0 }
  0xe8   :  { %v4042_v33 = vadd.f32 %v3513_v31, %v3327_v32  ;;  %v234_v34 = vpop.f32.mrb[3].mxu0 }
  0xe9   :  { %v4063_v43 = vadd.f32 %v3327_v32, %v234_v34 }
  0xeb   :  { %259 = vrot.lane.b32.xlu1 %v4034_v30, %s3922_s1  ;;  %253 = vrot.lane.b32.xlu0 %v4034_v30, %s3925_s24 }
  0xef   :  { %271 = vrot.lane.b32.xlu0 %v150_v29, %s3926_s27 }
 0x155   :  { %v258_v35 = vpop.permute.xlu1 %257  ;;  %v246_v36 = vpop.permute.xlu0 %245 }
 0x156   :  { %349 = vrot.lane.b32.xlu1 %v246_v36, %s3926_s27  ;;  %v4069_v45 = vmul.f32 0.35355338, %v246_v36  ;;  %v4076_v48 = vmul.f32 0.35355338, %v258_v35 }
 0x159   :  { %v252_v37 = vpop.permute.xlu0 %251  ;;  %v248_v38 = vpop.permute.xlu1 %247 }
 0x15a   :  { %503 = vrot.lane.b32.xlu1 %v258_v35, %s3926_s27  ;;  %426 = vrot.lane.b32.xlu0 %v252_v37, %s3926_s27  ;;  %v4078_v49 = vmul.f32 0.35355338, %v252_v37  ;;  %v4090_v52 = vmul.f32 0.35355338, %v248_v38 }
 0x15d   :  { %v254_v39 = vpop.permute.xlu0 %253  ;;  %v260_v40 = vpop.permute.xlu1 %259 }
 0x15e   :  { %657 = vrot.lane.b32.xlu1 %v248_v38, %s3926_s27  ;;  %580 = vrot.lane.b32.xlu0 %v4034_v30, %s3926_s27  ;;  %v4107_v56 = vmul.f32 0.35355338, %v260_v40  ;;  %v4109_v57 = vmul.f32 0.35355338, %v254_v39 }
 0x161   :  { %v272_v41 = vpop.permute.xlu0 %271 }
 0x162   :  { %811 = vrot.lane.b32.xlu1 %v260_v40, %s3926_s27  ;;  %734 = vrot.lane.b32.xlu0 %v254_v39, %s3926_s27 }
 0x163   :  { %3515 = vmatpush3.xpose.msk.msra.mxu0 %vm273_vm2, %v272_v41 }
 0x164   :  { %3519 = vmatprep.subr.mxu0 %v3921_v27 }
 0x166   :  { %3517 = vmatmul.mubr.msk.f32.vlgmr.msra.gmra.mrb[4].mxu0 %vm273_vm2, %v263_v42  ;;  %976 = vrot.lane.b32.xlu1 %v150_v29, %s3927_s4 }
 0x167   :  { %1280 = vrot.lane.b32.xlu0 %v4034_v30, %s3927_s4  ;;  %3521 = vmatprep.mubr.msk.f32.mxu0 %vm3924_vm1, %v3921_v27 }
 0x16a   :  { %1356 = vrot.lane.b32.xlu1 %v248_v38, %s3927_s4 }
 0x16b   :  { %1432 = vrot.lane.b32.xlu0 %v254_v39, %s3927_s4 }
 0x16e   :  { %1508 = vrot.lane.b32.xlu1 %v260_v40, %s3927_s4 }
 0x16f   :  { %1618 = vrot.lane.b32.xlu0 %v4063_v43, %s3923_s23 }
 0x172   :  { %1630 = vrot.lane.b32.xlu1 %v263_v42, %s3928_s28 }
 0x173   :  { %1052 = vrot.lane.b32.xlu0 %v246_v36, %s3927_s4 }
 0x176   :  { %1128 = vrot.lane.b32.xlu1 %v252_v37, %s3927_s4 }
 0x17a   :  { %1204 = vrot.lane.b32.xlu1 %v258_v35, %s3927_s4 }
 0x1c8   :  { %v350_v44 = vpop.permute.xlu1 %349 }
 0x1c9   :  { %3520 = vmatpush3.xpose.msk.msra.mxu0 %vm273_vm2, %v350_v44 }
 0x1ca   :  { %3524 = vmatprep.subr.mxu0 %v3921_v27 }
 0x1cc   :  { %v504_v46 = vpop.permute.xlu1 %503  ;;  %v427_v47 = vpop.permute.xlu0 %426  ;;  %3522 = vmatmul.mubr.msk.f32.vlgmr.msra.gmra.mrb[6].mxu0 %vm273_vm2, %v4069_v45 }
 0x1cd   :  { %3525 = vmatpush3.xpose.msk.msra.mxu0 %vm273_vm2, %v427_v47  ;;  %3530 = vmatpush3.xpose.msk.msra.mxu1 %vm273_vm2, %v504_v46 }
 0x1ce   :  { %3526 = vmatprep.mubr.msk.f32.mxu0 %vm3924_vm1, %v3921_v27  ;;  %3539 = vmatprep.subr.mxu1 %v3921_v27 }
 0x1cf   :  { %3534 = vmatprep.subr.mxu0 %v3921_v27 }
 0x1d0   :  { %3532 = vmatmul.mubr.msk.f32.vlgmr.msra.gmra.mrb[0].mxu1 %vm273_vm2, %v4076_v48  ;;  %v658_v50 = vpop.permute.xlu1 %657  ;;  %v581_v51 = vpop.permute.xlu0 %580  ;;  %3527 = vmatmul.mubr.msk.f32.vlgmr.msra.gmra.mrb[8].mxu0 %vm273_vm2, %v4078_v49 }
 0x1d1   :  { %3535 = vmatpush3.xpose.msk.msra.mxu0 %vm273_vm2, %v581_v51  ;;  %3540 = vmatpush3.xpose.msk.msra.mxu1 %vm273_vm2, %v658_v50 }
 0x1d2   :  { %3536 = vmatprep.mubr.msk.f32.mxu0 %vm3924_vm1, %v3921_v27  ;;  %3541 = vmatprep.mubr.msk.f32.mxu1 %vm3924_vm1, %v3921_v27 }
 0x1d3   :  { %3549 = vmatprep.subr.mxu1 %v3921_v27  ;;  %3544 = vmatprep.subr.mxu0 %v3921_v27 }
 0x1d4   :  { %3542 = vmatmul.mubr.msk.f32.vlgmr.msra.gmra.mrb[2].mxu1 %vm273_vm2, %v4090_v52  ;;  %v812_v54 = vpop.permute.xlu1 %811  ;;  %v735_v55 = vpop.permute.xlu0 %734  ;;  %3537 = vmatmul.mubr.msk.f32.vlgmr.msra.gmra.mrb[10].mxu0 %vm273_vm2, %v4097_v53 }
 0x1d5   :  { %3545 = vmatpush3.xpose.msk.msra.mxu0 %vm273_vm2, %v735_v55  ;;  %3550 = vmatpush3.xpose.msk.msra.mxu1 %vm273_vm2, %v812_v54 }
 0x1d6   :  { %3546 = vmatprep.mubr.msk.f32.mxu0 %vm3924_vm1, %v3921_v27  ;;  %3551 = vmatprep.mubr.msk.f32.mxu1 %vm3924_vm1, %v3921_v27 }
 0x1d7   :  { %3554 = vmatprep.subr.mxu0 %v3921_v27  ;;  %3559 = vmatprep.subr.mxu1 %v3921_v27 }
 0x1d8   :  { %3552 = vmatmul.mubr.msk.f32.vlgmr.msra.gmra.mrb[4].mxu1 %vm273_vm2, %v4107_v56  ;;  %v977_v58 = vpop.permute.xlu1 %976  ;;  %3547 = vmatmul.mubr.msk.f32.vlgmr.msra.gmra.mrb[12].mxu0 %vm273_vm2, %v4109_v57 }
 0x1d9   :  { %v4121_v59 = vpop.permute.xlu0 %1280  ;;  %3555 = vmatpush3.msra.mxu0 %v977_v58  ;;  %3556 = vmatprep.mubr.msk.f32.mxu0 %vm3924_vm1, %v3921_v27 }
 0x1da   :  { %3564 = vmatprep.subr.mxu0 %v3921_v27  ;;  %3561 = vmatprep.mubr.msk.f32.mxu1 %vm3924_vm1, %v3921_v27 }
 0x1dc   :  { %v4152_v34 = vpop.permute.xlu1 %1356 }
 0x1dd   :  { %v4128_v60 = vpop.permute.xlu0 %1432 }
 0x1e0   :  { %v4154_v35 = vpop.permute.xlu1 %1508 }
 0x1e1   :  { %v4130_v61 = vpop.permute.xlu0 %1618 }
 0x1e4   :  { %v4156_v36 = vpop.permute.xlu1 %1630 }
 0x1e5   :  { %v1053_v62 = vpop.permute.xlu0 %1052 }
 0x1e6   :  { %3560 = vmatpush3.msra.mxu1 %v1053_v62 }
 0x1e7   :  { %3569 = vmatprep.subr.mxu1 %v3921_v27 }
 0x1e8   :  { %v1129_v37 = vpop.permute.xlu1 %1128 }
 0x1ec   :  { %v4158_v38 = vpop.permute.xlu1 %1204 }
 0x239   :  { %v345_v63 = vpop.f32.mrb[4].mxu0 }
 0x23a   :  { %v3518_v0 = vpop.f32.mrb[5].mxu0  ;;  %v888_v1 = vsel %vm273_vm2, %v345_v63, -inf }
 0x23b   :  { %889 = vmax.xlane.f32.xlu0 %v888_v1 }
 0x29f   :  { %v422_v2 = vpop.f32.mrb[6].mxu0 }
 0x2a0   :  { %v3523_v3 = vpop.f32.mrb[7].mxu0  ;;  %v891_v4 = vsel %vm273_vm2, %v422_v2, -inf }
 0x2a1   :  { %892 = vmax.xlane.f32.xlu1 %v891_v4 }
 0x2a3   :  { %v499_v5 = vpop.f32.mrb[8].mxu0  ;;  %v576_v6 = vpop.f32.mrb[0].mxu1 }
 0x2a4   :  { %v3528_v7 = vpop.f32.mrb[9].mxu0  ;;  %v3533_v9 = vpop.f32.mrb[1].mxu1  ;;  %v897_v10 = vsel %vm273_vm2, %v576_v6, -inf  ;;  %v894_v15 = vsel %vm273_vm2, %v499_v5, -inf }
 0x2a5   :  { %898 = vmax.xlane.f32.xlu0 %v897_v10 }
 0x2a7   :  { %v4136_v11 = vpop.f32.mrb[10].mxu0  ;;  %v730_v12 = vpop.f32.mrb[2].mxu1 }
 0x2a8   :  { %v3538_v13 = vpop.f32.mrb[11].mxu0  ;;  %v3543_v14 = vpop.f32.mrb[3].mxu1  ;;  %v900_v17 = vsel %vm273_vm2, %v4136_v11, -inf  ;;  %v903_v24 = vsel %vm273_vm2, %v730_v12, -inf }
 0x2a9   :  { %895 = vmax.xlane.f32.xlu0 %v894_v15  ;;  %901 = vmax.xlane.f32.xlu1 %v900_v17 }
 0x2ab   :  { %v4141_v18 = vpop.f32.mrb[12].mxu0  ;;  %v884_v19 = vpop.f32.mrb[4].mxu1 }
 0x2ac   :  { %v3548_v20 = vpop.f32.mrb[13].mxu0  ;;  %v3553_v21 = vpop.f32.mrb[5].mxu1  ;;  %v909_v25 = vsel %vm273_vm2, %v884_v19, -inf  ;;  %v906_v30 = vsel %vm273_vm2, %v4141_v18, -inf }
 0x2ad   :  { %904 = vmax.xlane.f32.xlu0 %v903_v24 }
 0x2b1   :  { %910 = vmax.xlane.f32.xlu0 %v909_v25 }
 0x2ba   :  { %1706 = vrot.lane.b32.xlu1 %v4069_v45, %s3928_s28 }
 0x2c7   :  { %1622 = vrot.lane.b32.xlu0 %v4063_v43, %s3925_s24 }
 0x2c8   :  { %v890_v26 = vpop.xlane.xlu0 %889 }
 0x2c9   :  { %v912_v28 = vsub.f32 %v345_v63, %v890_v26 }
 0x2cb   :  { %v920_v29 = vmul.f32 1.442695, %v912_v28 }
 0x2cd   :  { %3824 = vpow2.f32 %v920_v29 }
 0x2d7   :  { %v3825_v31 = vpop.eup %3824 }
 0x2d8   :  { %v936_v32 = vsel %vm273_vm2, %v3825_v31, 0.0 }
 0x2de   :  { %907 = vmax.xlane.f32.xlu1 %v906_v30 }
 0x2e2   :  { %937 = vadd.xlane.f32.xlu1 %v936_v32 }
 0x32e   :  { %v893_v39 = vpop.xlane.xlu1 %892 }
 0x32f   :  { %v913_v40 = vsub.f32 %v422_v2, %v893_v39 }
 0x331   :  { %v922_v41 = vmul.f32 1.442695, %v913_v40 }
 0x332   :  { %v899_v42 = vpop.xlane.xlu0 %898 }
 0x333   :  { %3826 = vpow2.f32 %v922_v41  ;;  %v915_v44 = vsub.f32 %v576_v6, %v899_v42 }
 0x335   :  { %v926_v45 = vmul.f32 1.442695, %v915_v44 }
 0x336   :  { %v896_v46 = vpop.xlane.xlu0 %895 }
 0x337   :  { %3828 = vpow2.f32 %v926_v45  ;;  %v914_v47 = vsub.f32 %v499_v5, %v896_v46  ;;  %v902_v5 = vpop.xlane.xlu1 %901 }
 0x338   :  { %v916_v6 = vsub.f32 %v4136_v11, %v902_v5 }
 0x339   :  { %v924_v50 = vmul.f32 1.442695, %v914_v47 }
 0x33a   :  { %v905_v51 = vpop.xlane.xlu0 %904  ;;  %v928_v10 = vmul.f32 1.442695, %v916_v6 }
 0x33b   :  { %3830 = vpow2.f32 %v924_v50  ;;  %v917_v54 = vsub.f32 %v730_v12, %v905_v51  ;;  %v4178_v7 = vpop.permute.xlu1 %1706 }
 0x33d   :  { %v3827_v55 = vpop.eup %3826  ;;  %v930_v58 = vmul.f32 1.442695, %v917_v54 }
 0x33e   :  { %v939_v62 = vsel %vm273_vm2, %v3827_v55, 0.0  ;;  %v911_v9 = vpop.xlane.xlu0 %910 }
 0x33f   :  { %3832 = vpow2.f32 %v930_v58  ;;  %940 = vadd.xlane.f32.xlu0 %v939_v62  ;;  %v919_v12 = vsub.f32 %v884_v19, %v911_v9 }
 0x340   :  { %3834 = vpow2.f32 %v928_v10 }
 0x341   :  { %v4161_v63 = vpop.eup %3828  ;;  %v934_v14 = vmul.f32 1.442695, %v919_v12 }
 0x342   :  { %v945_v0 = vsel %vm273_vm2, %v4161_v63, 0.0 }
 0x343   :  { %946 = vadd.xlane.f32.xlu0 %v945_v0 }
 0x345   :  { %v4165_v1 = vpop.eup %3830 }
 0x346   :  { %v942_v2 = vsel %vm273_vm2, %v4165_v1, 0.0 }
 0x347   :  { %943 = vadd.xlane.f32.xlu1 %v942_v2 }
 0x349   :  { %v4169_v3 = vpop.eup %3832 }
 0x34a   :  { %v951_v4 = vsel %vm273_vm2, %v4169_v3, 0.0  ;;  %v4180_v17 = vpop.eup %3834 }
 0x34b   :  { %952 = vadd.xlane.f32.xlu0 %v951_v4  ;;  %v948_v20 = vsel %vm273_vm2, %v4180_v17, 0.0 }
 0x358   :  { %1782 = vrot.lane.b32.xlu1 %v4078_v49, %s3928_s28 }
 0x361   :  { %1626 = vrot.lane.b32.xlu0 %v4063_v43, %s3922_s1 }
 0x36b   :  { %v908_v13 = vpop.xlane.xlu1 %907 }
 0x36c   :  { %v918_v24 = vsub.f32 %v4141_v18, %v908_v13 }
 0x36e   :  { %v932_v25 = vmul.f32 1.442695, %v918_v24 }
 0x36f   :  { %v938_v15 = vpop.xlane.xlu1 %937 }
 0x370   :  { %3836 = vrcp.f32 %v938_v15 }
 0x371   :  { %3838 = vpow2.f32 %v934_v14 }
 0x372   :  { %3840 = vpow2.f32 %v932_v25 }
 0x37a   :  { %v3837_v49 = vpop.eup %3836 }
 0x37b   :  { %v4184_v21 = vpop.eup %3838  ;;  %v961_v11 = vmul.f32 %v3837_v49, %v3825_v31 }
 0x37c   :  { %949 = vadd.xlane.f32.xlu1 %v948_v20  ;;  %v957_v19 = vsel %vm273_vm2, %v4184_v21, 0.0  ;;  %v4203_v26 = vpop.eup %3840 }
 0x37d   :  { %3557 = vmatmul.mubr.msk.f32.vlgmr.msra.gmra.mrb[14].mxu0 %vm273_vm2, %v961_v11  ;;  %v954_v28 = vsel %vm273_vm2, %v4203_v26, 0.0 }
 0x37e   :  { %3565 = vmatpush3.msra.mxu0 %v1129_v37  ;;  %3566 = vmatprep.mubr.msk.f32.mxu0 %vm3924_vm1, %v3921_v27 }
 0x37f   :  { %3574 = vmatprep.subr.mxu0 %v3921_v27 }
 0x380   :  { %958 = vadd.xlane.f32.xlu0 %v957_v19 }
 0x38d   :  { %1620 = vrot.lane.b32.xlu1 %v4042_v33, %s3923_s23 }
 0x396   :  { %1858 = vrot.lane.b32.xlu0 %v4076_v48, %s3928_s28  ;;  %v4211_v48 = vpop.permute.xlu0 %1622 }
 0x39a   :  { %1934 = vrot.lane.b32.xlu0 %v4097_v53, %s3928_s28 }
 0x39e   :  { %2010 = vrot.lane.b32.xlu0 %v4090_v52, %s3928_s28 }
 0x3a2   :  { %2086 = vrot.lane.b32.xlu0 %v4109_v57, %s3928_s28 }
 0x3b1   :  { %955 = vadd.xlane.f32.xlu1 %v954_v28 }
 0x3c2   :  { %1624 = vrot.lane.b32.xlu1 %v4042_v33, %s3925_s24 }
 0x3c6   :  { %1628 = vrot.lane.b32.xlu1 %v4042_v33, %s3922_s1 }
 0x3ca   :  { %2162 = vrot.lane.b32.xlu1 %v4107_v56, %s3928_s28 }
 0x3cc   :  { %v941_v52 = vpop.xlane.xlu0 %940 }
 0x3cd   :  { %3842 = vrcp.f32 %v941_v52 }
 0x3d0   :  { %v947_v53 = vpop.xlane.xlu0 %946 }
 0x3d1   :  { %3844 = vrcp.f32 %v947_v53 }
 0x3d4   :  { %v944_v57 = vpop.xlane.xlu1 %943 }
 0x3d5   :  { %3846 = vrcp.f32 %v944_v57 }
 0x3d7   :  { %v3843_v18 = vpop.eup %3842 }
 0x3d8   :  { %v963_v29 = vmul.f32 %v3843_v18, %v3827_v55  ;;  %v953_v30 = vpop.xlane.xlu0 %952 }
 0x3d9   :  { %3848 = vrcp.f32 %v953_v30 }
 0x3da   :  { %3562 = vmatmul.mubr.msk.f32.vlgmr.msra.gmra.mrb[6].mxu1 %vm273_vm2, %v963_v29 }
 0x3db   :  { %v3845_v31 = vpop.eup %3844  ;;  %3570 = vmatpush3.msra.mxu1 %v4158_v38  ;;  %3571 = vmatprep.mubr.msk.f32.mxu1 %vm3924_vm1, %v3921_v27 }
 0x3dc   :  { %v967_v56 = vmul.f32 %v3845_v31, %v4161_v63  ;;  %3579 = vmatprep.subr.mxu1 %v3921_v27  ;;  %v4238_v40 = vpop.permute.xlu0 %1626 }
 0x3de   :  { %3572 = vmatmul.mubr.msk.f32.vlgmr.msra.gmra.mrb[8].mxu1 %vm273_vm2, %v967_v56 }
 0x3df   :  { %v3847_v32 = vpop.eup %3846  ;;  %3580 = vmatpush3.msra.mxu1 %v4152_v34  ;;  %3581 = vmatprep.mubr.msk.f32.mxu1 %vm3924_vm1, %v3921_v27  ;;  %v1783_v34 = vpop.permute.xlu1 %1782 }
 0x3e0   :  { %v965_v37 = vmul.f32 %v3847_v32, %v4165_v1  ;;  %3589 = vmatprep.subr.mxu1 %v3921_v27 }
 0x3e2   :  { %3567 = vmatmul.mubr.msk.f32.vlgmr.msra.gmra.mrb[16].mxu0 %vm273_vm2, %v965_v37 }
 0x3e3   :  { %v3849_v38 = vpop.eup %3848  ;;  %3575 = vmatpush3.msra.mxu0 %v4121_v59  ;;  %3576 = vmatprep.mubr.msk.f32.mxu0 %vm3924_vm1, %v3921_v27 }
 0x3e4   :  { %v971_v39 = vmul.f32 %v3849_v38, %v4169_v3  ;;  %3584 = vmatprep.subr.mxu0 %v3921_v27 }
 0x3e6   :  { %3582 = vmatmul.mubr.msk.f32.vlgmr.msra.gmra.mrb[10].mxu1 %vm273_vm2, %v971_v39 }
 0x3e7   :  { %3590 = vmatpush3.msra.mxu1 %v4154_v35  ;;  %3591 = vmatprep.mubr.msk.f32.mxu1 %vm3924_vm1, %v3921_v27 }
 0x3e8   :  { %3599 = vmatprep.subr.mxu1 %v3921_v27 }
 0x409   :  { %v950_v59 = vpop.xlane.xlu1 %949 }
 0x40a   :  { %3850 = vrcp.f32 %v950_v59 }
 0x40d   :  { %v959_v41 = vpop.xlane.xlu0 %958  ;;  %v4260_v47 = vpop.permute.xlu1 %1620 }
 0x40e   :  { %3852 = vrcp.f32 %v959_v41 }
 0x411   :  { %v1859_v46 = vpop.permute.xlu0 %1858 }
 0x414   :  { %v3851_v42 = vpop.eup %3850 }
 0x415   :  { %v969_v44 = vmul.f32 %v3851_v42, %v4180_v17 }
 0x417   :  { %3577 = vmatmul.mubr.msk.f32.vlgmr.msra.gmra.mrb[18].mxu0 %vm273_vm2, %v969_v44 }
 0x418   :  { %v3853_v45 = vpop.eup %3852  ;;  %3585 = vmatpush3.msra.mxu0 %v4128_v60  ;;  %3586 = vmatprep.mubr.msk.f32.mxu0 %vm3924_vm1, %v3921_v27  ;;  %v1935_v60 = vpop.permute.xlu0 %1934 }
 0x419   :  { %v975_v35 = vmul.f32 %v3853_v45, %v4184_v21  ;;  %3594 = vmatprep.subr.mxu0 %v3921_v27 }
 0x41b   :  { %3592 = vmatmul.mubr.msk.f32.vlgmr.msra.gmra.mrb[12].mxu1 %vm273_vm2, %v975_v35 }
 0x41c   :  { %3600 = vmatpush3.xpose.msk.msra.mxu1 %vm273_vm2, %v4130_v61  ;;  %3601 = vmatprep.mubr.msk.f32.mxu1 %vm3924_vm1, %v3921_v27  ;;  %v2011_v50 = vpop.permute.xlu0 %2010 }
 0x41d   :  { %3609 = vmatprep.subr.mxu1 %v3921_v27 }
 0x41f   :  { %3602 = vmatmul.mubr.msk.f32.vlgmr.msra.gmra.mrb[14].mxu1 %vm273_vm2, %v4178_v7 }
 0x420   :  { %3610 = vmatpush3.xpose.msk.msra.mxu1 %vm273_vm2, %v4238_v40  ;;  %3611 = vmatprep.mubr.msk.f32.mxu1 %vm3924_vm1, %v3921_v27 }
 0x421   :  { %3619 = vmatprep.subr.mxu1 %v3921_v27 }
 0x423   :  { %3612 = vmatmul.mubr.msk.f32.vlgmr.msra.gmra.mrb[16].mxu1 %vm273_vm2, %v1859_v46 }
 0x424   :  { %3620 = vmatpush3.xpose.msk.msra.mxu1 %vm273_vm2, %v4260_v47  ;;  %3621 = vmatprep.mubr.msk.f32.mxu1 %vm3924_vm1, %v3921_v27 }
 0x425   :  { %3629 = vmatprep.subr.mxu1 %v3921_v27 }
 0x427   :  { %3622 = vmatmul.mubr.msk.f32.vlgmr.msra.gmra.mrb[18].mxu1 %vm273_vm2, %v2011_v50 }
 0x428   :  { %3631 = vmatprep.mubr.msk.f32.mxu1 %vm3924_vm1, %v3921_v27 }
 0x43e   :  { %v956_v51 = vpop.xlane.xlu1 %955 }
 0x43f   :  { %3854 = vrcp.f32 %v956_v51 }
 0x442   :  { %v4271_v54 = vpop.permute.xlu1 %1624 }
 0x446   :  { %v4273_v55 = vpop.permute.xlu1 %1628 }
 0x447   :  { %3630 = vmatpush3.xpose.msk.msra.mxu1 %vm273_vm2, %v4273_v55 }
 0x448   :  { %3639 = vmatprep.subr.mxu1 %v3921_v27 }
 0x449   :  { %v3855_v58 = vpop.eup %3854 }
 0x44a   :  { %v973_v62 = vmul.f32 %v3855_v58, %v4203_v26  ;;  %v2163_v63 = vpop.permute.xlu1 %2162 }
 0x44b   :  { %3632 = vmatmul.mubr.msk.f32.vlgmr.msra.gmra.mrb[20].mxu1 %vm273_vm2, %v2163_v63 }
 0x44c   :  { %3587 = vmatmul.mubr.msk.f32.vlgmr.msra.gmra.mrb[20].mxu0 %vm273_vm2, %v973_v62  ;;  %3641 = vmatprep.mubr.msk.f32.mxu1 %vm3924_vm1, %v3921_v27 }
 0x44d   :  { %3595 = vmatpush3.xpose.msk.msra.mxu0 %vm273_vm2, %v4063_v43  ;;  %3596 = vmatprep.mubr.msk.f32.mxu0 %vm3924_vm1, %v3921_v27 }
 0x44e   :  { %3604 = vmatprep.subr.mxu0 %v3921_v27 }
 0x450   :  { %3597 = vmatmul.mubr.msk.f32.vlgmr.msra.gmra.mrb[22].mxu0 %vm273_vm2, %v4156_v36  ;;  %v4290_v0 = vpop.f32.mrb[14].mxu0  ;;  %v2087_v36 = vpop.permute.xlu0 %2086 }
 0x451   :  { %3605 = vmatpush3.xpose.msk.msra.mxu0 %vm273_vm2, %v4211_v48  ;;  %3606 = vmatprep.mubr.msk.f32.mxu0 %vm3924_vm1, %v3921_v27  ;;  %v3558_v1 = vpop.f32.mrb[15].mxu0 }
 0x452   :  { %3614 = vmatprep.subr.mxu0 %v3921_v27 }
 0x454   :  { %3607 = vmatmul.mubr.msk.f32.vlgmr.msra.gmra.mrb[24].mxu0 %vm273_vm2, %v1783_v34 }
 0x455   :  { %3615 = vmatpush3.xpose.msk.msra.mxu0 %vm273_vm2, %v4042_v33  ;;  %3616 = vmatprep.mubr.msk.f32.mxu0 %vm3924_vm1, %v3921_v27 }
 0x456   :  { %3624 = vmatprep.subr.mxu0 %v3921_v27 }
 0x458   :  { %3617 = vmatmul.mubr.msk.f32.vlgmr.msra.gmra.mrb[26].mxu0 %vm273_vm2, %v1935_v60 }
 0x459   :  { %3625 = vmatpush3.xpose.msk.msra.mxu0 %vm273_vm2, %v4271_v54  ;;  %3626 = vmatprep.mubr.msk.f32.mxu0 %vm3924_vm1, %v3921_v27 }
 0x45a   :  { %3634 = vmatprep.subr.mxu0 %v3921_v27 }
 0x45c   :  { %3627 = vmatmul.mubr.msk.f32.vlgmr.msra.gmra.mrb[28].mxu0 %vm273_vm2, %v2087_v36 }
 0x45d   :  { %3636 = vmatprep.mubr.msk.f32.mxu0 %vm3924_vm1, %v3921_v27 }
 0x4ad   :  { %v4312_v2 = vpop.f32.mrb[6].mxu1 }
 0x4ae   :  { %v3563_v3 = vpop.f32.mrb[7].mxu1 }
 0x4b1   :  { %v4314_v4 = vpop.f32.mrb[8].mxu1 }
 0x4b2   :  { %v3573_v5 = vpop.f32.mrb[9].mxu1 }
 0x4b5   :  { %v4316_v6 = vpop.f32.mrb[16].mxu0 }
 0x4b6   :  { %v3568_v7 = vpop.f32.mrb[17].mxu0 }
 0x4b9   :  { %v4318_v9 = vpop.f32.mrb[10].mxu1 }
 0x4ba   :  { %v3583_v10 = vpop.f32.mrb[11].mxu1 }
 0x4ea   :  { %v4320_v12 = vpop.f32.mrb[18].mxu0 }
 0x4eb   :  { %v3578_v13 = vpop.f32.mrb[19].mxu0 }
 0x4ee   :  { %v4322_v14 = vpop.f32.mrb[12].mxu1 }
 0x4ef   :  { %v3593_v15 = vpop.f32.mrb[13].mxu1 }
 0x4f2   :  { %v1778_v17 = vpop.f32.mrb[14].mxu1 }
 0x4f3   :  { %v3603_v49 = vpop.f32.mrb[15].mxu1  ;;  %v2241_v20 = vsel %vm273_vm2, %v1778_v17, -inf }
 0x4f4   :  { %2242 = vmax.xlane.f32.xlu1 %v2241_v20 }
 0x4f6   :  { %v1930_v21 = vpop.f32.mrb[16].mxu1 }
 0x4f7   :  { %v3613_v11 = vpop.f32.mrb[17].mxu1  ;;  %v2247_v37 = vsel %vm273_vm2, %v1930_v21, -inf }
 0x4fa   :  { %v2082_v19 = vpop.f32.mrb[18].mxu1 }
 0x4fb   :  { %v3623_v24 = vpop.f32.mrb[19].mxu1  ;;  %v2253_v59 = vsel %vm273_vm2, %v2082_v19, -inf }
 0x51e   :  { %v4325_v25 = vpop.f32.mrb[20].mxu1 }
 0x51f   :  { %v4327_v26 = vpop.f32.mrb[20].mxu0  ;;  %v3633_v28 = vpop.f32.mrb[21].mxu1  ;;  %v2259_v42 = vsel %vm273_vm2, %v4325_v25, -inf }
 0x520   :  { %v3588_v52 = vpop.f32.mrb[21].mxu0 }
 0x523   :  { %v1702_v53 = vpop.f32.mrb[22].mxu0 }
 0x524   :  { %v3598_v57 = vpop.f32.mrb[23].mxu0  ;;  %v2238_v18 = vsel %vm273_vm2, %v1702_v53, -inf }
 0x525   :  { %2239 = vmax.xlane.f32.xlu0 %v2238_v18 }
 0x527   :  { %v1854_v29 = vpop.f32.mrb[24].mxu0 }
 0x528   :  { %v3608_v30 = vpop.f32.mrb[25].mxu0  ;;  %v2244_v31 = vsel %vm273_vm2, %v1854_v29, -inf }
 0x529   :  { %2245 = vmax.xlane.f32.xlu0 %v2244_v31 }
 0x52b   :  { %v2006_v56 = vpop.f32.mrb[26].mxu0 }
 0x52c   :  { %v3618_v32 = vpop.f32.mrb[27].mxu0  ;;  %v2250_v38 = vsel %vm273_vm2, %v2006_v56, -inf }
 0x52d   :  { %2248 = vmax.xlane.f32.xlu0 %v2247_v37  ;;  %2251 = vmax.xlane.f32.xlu1 %v2250_v38 }
 0x52f   :  { %v2158_v39 = vpop.f32.mrb[28].mxu0 }
 0x530   :  { %v3628_v34 = vpop.f32.mrb[29].mxu0  ;;  %v2256_v41 = vsel %vm273_vm2, %v2158_v39, -inf }
 0x531   :  { %2254 = vmax.xlane.f32.xlu0 %v2253_v59  ;;  %2257 = vmax.xlane.f32.xlu1 %v2256_v41 }
 0x535   :  { %2260 = vmax.xlane.f32.xlu0 %v2259_v42 }
 0x542   :  { %2326 = vrot.lane.b32.xlu1 %v4063_v43, %s3926_s27 }
 0x546   :  { %2478 = vrot.lane.b32.xlu1 %v4211_v48, %s3926_s27 }
 0x54a   :  { %2554 = vrot.lane.b32.xlu1 %v4238_v40, %s3926_s27 }
 0x54b   :  { %2402 = vrot.lane.b32.xlu0 %v4130_v61, %s3926_s27 }
 0x54e   :  { %2706 = vrot.lane.b32.xlu1 %v4260_v47, %s3926_s27 }
 0x54f   :  { %2630 = vrot.lane.b32.xlu0 %v4042_v33, %s3926_s27 }
 0x581   :  { %v2243_v44 = vpop.xlane.xlu1 %2242 }
 0x582   :  { %v2263_v45 = vsub.f32 %v1778_v17, %v2243_v44 }
 0x584   :  { %v2272_v35 = vmul.f32 1.442695, %v2263_v45 }
 0x586   :  { %3856 = vpow2.f32 %v2272_v35 }
 0x590   :  { %v4349_v43 = vpop.eup %3856 }
 0x591   :  { %v2289_v48 = vsel %vm273_vm2, %v4349_v43, 0.0 }
 0x592   :  { %2290 = vadd.xlane.f32.xlu0 %v2289_v48 }
 0x5b2   :  { %v2240_v40 = vpop.xlane.xlu0 %2239 }
 0x5b3   :  { %v2262_v46 = vsub.f32 %v1702_v53, %v2240_v40 }
 0x5b5   :  { %v2270_v60 = vmul.f32 1.442695, %v2262_v46 }
 0x5b6   :  { %v2246_v61 = vpop.xlane.xlu0 %2245 }
 0x5b7   :  { %3858 = vpow2.f32 %v2270_v60  ;;  %v2264_v50 = vsub.f32 %v1854_v29, %v2246_v61 }
 0x5b9   :  { %v2274_v47 = vmul.f32 1.442695, %v2264_v50 }
 0x5ba   :  { %v2249_v51 = vpop.xlane.xlu0 %2248  ;;  %v2252_v58 = vpop.xlane.xlu1 %2251 }
 0x5bb   :  { %3860 = vpow2.f32 %v2274_v47  ;;  %v2265_v33 = vsub.f32 %v1930_v21, %v2249_v51  ;;  %v2266_v62 = vsub.f32 %v2006_v56, %v2252_v58 }
 0x5bd   :  { %v2276_v63 = vmul.f32 1.442695, %v2265_v33  ;;  %v2278_v1 = vmul.f32 1.442695, %v2266_v62 }
 0x5be   :  { %v2255_v36 = vpop.xlane.xlu0 %2254  ;;  %v2258_v3 = vpop.xlane.xlu1 %2257 }
 0x5bf   :  { %3862 = vpow2.f32 %v2276_v63  ;;  %v2267_v5 = vsub.f32 %v2082_v19, %v2255_v36  ;;  %v2268_v7 = vsub.f32 %v2158_v39, %v2258_v3 }
 0x5c0   :  { %3864 = vpow2.f32 %v2278_v1 }
 0x5c1   :  { %v3859_v10 = vpop.eup %3858  ;;  %v2280_v13 = vmul.f32 1.442695, %v2267_v5  ;;  %v2282_v15 = vmul.f32 1.442695, %v2268_v7 }
 0x5c2   :  { %v2261_v17 = vpop.xlane.xlu0 %2260  ;;  %v2327_v49 = vpop.permute.xlu1 %2326  ;;  %v2286_v20 = vsel %vm273_vm2, %v3859_v10, 0.0 }
 0x5c3   :  { %3866 = vpow2.f32 %v2280_v13  ;;  %v2269_v11 = vsub.f32 %v4325_v25, %v2261_v17  ;;  %2287 = vadd.xlane.f32.xlu1 %v2286_v20  ;;  %3635 = vmatpush3.msra.mxu0 %v2327_v49 }
 0x5c4   :  { %3868 = vpow2.f32 %v2282_v15  ;;  %3644 = vmatprep.subr.mxu0 %v3921_v27 }
 0x5c5   :  { %v3861_v21 = vpop.eup %3860  ;;  %v2284_v24 = vmul.f32 1.442695, %v2269_v11 }
 0x5c6   :  { %v2403_v19 = vpop.permute.xlu0 %2402  ;;  %v2292_v28 = vsel %vm273_vm2, %v3861_v21, 0.0  ;;  %v2479_v39 = vpop.permute.xlu1 %2478 }
 0x5c7   :  { %3870 = vpow2.f32 %v2284_v24  ;;  %3640 = vmatpush3.msra.mxu1 %v2403_v19  ;;  %2293 = vadd.xlane.f32.xlu1 %v2292_v28 }
 0x5c8   :  { %3649 = vmatprep.subr.mxu1 %v3921_v27 }
 0x5c9   :  { %v3863_v52 = vpop.eup %3862 }
 0x5ca   :  { %v3865_v53 = vpop.eup %3864  ;;  %v2295_v57 = vsel %vm273_vm2, %v3863_v52, 0.0  ;;  %v2631_v37 = vpop.permute.xlu0 %2630 }
 0x5cb   :  { %2296 = vadd.xlane.f32.xlu0 %v2295_v57  ;;  %v2298_v25 = vsel %vm273_vm2, %v3865_v53, 0.0  ;;  %v2555_v41 = vpop.permute.xlu1 %2554 }
 0x5cc   :  { %2299 = vadd.xlane.f32.xlu1 %v2298_v25 }
 0x5cd   :  { %v3867_v18 = vpop.eup %3866 }
 0x5ce   :  { %v3869_v29 = vpop.eup %3868  ;;  %v2301_v30 = vsel %vm273_vm2, %v3867_v18, 0.0 }
 0x5cf   :  { %2302 = vadd.xlane.f32.xlu0 %v2301_v30  ;;  %v2304_v31 = vsel %vm273_vm2, %v3869_v29, 0.0 }
 0x5d0   :  { %2305 = vadd.xlane.f32.xlu1 %v2304_v31  ;;  %v67_v31 = vld [vmem:[%s4561_s5 + $0xa0] sm:$0xff] }
 0x5d1   :  { %v4362_v56 = vpop.eup %3870 }
 0x5d2   :  { %v2307_v32 = vsel %vm273_vm2, %v4362_v56, 0.0 }
 0x5d3   :  { %2308 = vadd.xlane.f32.xlu0 %v2307_v32 }
 0x5e1   :  { %2858 = vrot.lane.b32.xlu1 %v4273_v55, %s3926_s27  ;;  %v2707_v55 = vpop.permute.xlu1 %2706 }
 0x5e9   :  { %2782 = vrot.lane.b32.xlu0 %v4271_v54, %s3926_s27 }
 0x61f   :  { %v2291_v38 = vpop.xlane.xlu0 %2290 }
 0x620   :  { %3872 = vrcp.f32 %v2291_v38 }
 0x62a   :  { %v3873_v34 = vpop.eup %3872 }
 0x62b   :  { %v2313_v59 = vmul.f32 %v3873_v34, %v4349_v43 }
 0x62d   :  { %3642 = vmatmul.mubr.msk.f32.vlgmr.msra.gmra.mrb[22].mxu1 %vm273_vm2, %v2313_v59 }
 0x62e   :  { %3650 = vmatpush3.msra.mxu1 %v2555_v41  ;;  %3651 = vmatprep.mubr.msk.f32.mxu1 %vm3924_vm1, %v3921_v27 }
 0x62f   :  { %3659 = vmatprep.subr.mxu1 %v3921_v27 }
 0x650   :  { %v2288_v42 = vpop.xlane.xlu1 %2287 }
 0x651   :  { %3874 = vrcp.f32 %v2288_v42 }
 0x654   :  { %v2294_v54 = vpop.xlane.xlu1 %2293 }
 0x655   :  { %3876 = vrcp.f32 %v2294_v54 }
 0x658   :  { %v2297_v44 = vpop.xlane.xlu0 %2296 }
 0x659   :  { %3878 = vrcp.f32 %v2297_v44  ;;  %v2300_v45 = vpop.xlane.xlu1 %2299 }
 0x65a   :  { %3880 = vrcp.f32 %v2300_v45 }
 0x65b   :  { %v3875_v35 = vpop.eup %3874 }
 0x65c   :  { %v2311_v43 = vmul.f32 %v3875_v35, %v3859_v10  ;;  %v2303_v48 = vpop.xlane.xlu0 %2302 }
 0x65d   :  { %3882 = vrcp.f32 %v2303_v48  ;;  %v2306_v40 = vpop.xlane.xlu1 %2305 }
 0x65e   :  { %3884 = vrcp.f32 %v2306_v40  ;;  %3637 = vmatmul.mubr.msk.f32.vlgmr.msra.gmra.mrb[30].mxu0 %vm273_vm2, %v2311_v43 }
 0x65f   :  { %v3877_v46 = vpop.eup %3876  ;;  %3645 = vmatpush3.msra.mxu0 %v2479_v39  ;;  %3646 = vmatprep.mubr.msk.f32.mxu0 %vm3924_vm1, %v3921_v27 }
 0x660   :  { %v2315_v60 = vmul.f32 %v3877_v46, %v3861_v21  ;;  %v2309_v61 = vpop.xlane.xlu0 %2308  ;;  %3654 = vmatprep.subr.mxu0 %v3921_v27 }
 0x661   :  { %3886 = vrcp.f32 %v2309_v61  ;;  %v2859_v3 = vpop.permute.xlu1 %2858 }
 0x662   :  { %3647 = vmatmul.mubr.msk.f32.vlgmr.msra.gmra.mrb[32].mxu0 %vm273_vm2, %v2315_v60 }
 0x663   :  { %v3879_v50 = vpop.eup %3878  ;;  %3655 = vmatpush3.msra.mxu0 %v2631_v37  ;;  %3656 = vmatprep.mubr.msk.f32.mxu0 %vm3924_vm1, %v3921_v27 }
 0x664   :  { %v3881_v47 = vpop.eup %3880  ;;  %v2317_v51 = vmul.f32 %v3879_v50, %v3863_v52  ;;  %3664 = vmatprep.subr.mxu0 %v3921_v27  ;;  %v2783_v33 = vpop.permute.xlu0 %2782 }
 0x665   :  { %v2319_v58 = vmul.f32 %v3881_v47, %v3865_v53 }
 0x666   :  { %3652 = vmatmul.mubr.msk.f32.vlgmr.msra.gmra.mrb[24].mxu1 %vm273_vm2, %v2317_v51 }
 0x667   :  { %v3883_v62 = vpop.eup %3882  ;;  %3657 = vmatmul.mubr.msk.f32.vlgmr.msra.gmra.mrb[34].mxu0 %vm273_vm2, %v2319_v58  ;;  %3660 = vmatpush3.msra.mxu1 %v2707_v55 }
 0x668   :  { %v3885_v63 = vpop.eup %3884  ;;  %v2321_v1 = vmul.f32 %v3883_v62, %v3867_v18  ;;  %3665 = vmatpush3.msra.mxu0 %v2783_v33  ;;  %3661 = vmatprep.mubr.msk.f32.mxu1 %vm3924_vm1, %v3921_v27  ;;  %v63_v18 = vld [vmem:[%s4561_s5 + $0x80] sm:$0xff] }
 0x669   :  { %v2323_v36 = vmul.f32 %v3885_v63, %v3869_v29  ;;  %3666 = vmatprep.mubr.msk.f32.mxu0 %vm3924_vm1, %v3921_v27  ;;  %3669 = vmatprep.subr.mxu1 %v3921_v27  ;;  %v64_v29 = vld [vmem:[%s4561_s5 + $0x88] sm:$0xff] }
 0x66a   :  { %3662 = vmatmul.mubr.msk.f32.vlgmr.msra.gmra.mrb[26].mxu1 %vm273_vm2, %v2321_v1  ;;  %v3755_v30 = vpack.c.bf16 %v64_v29, %v63_v18  ;;  %v39_v18 = vld [vmem:[%s4559_s3 + $0x30] sm:$0xff]  ;;  %v40_v29 = vld [vmem:[%s4559_s3 + $0x38] sm:$0xff] }
 0x66b   :  { %v3887_v5 = vpop.eup %3886  ;;  %3667 = vmatmul.mubr.msk.f32.vlgmr.msra.gmra.mrb[36].mxu0 %vm273_vm2, %v2323_v36  ;;  %3670 = vmatpush3.msra.mxu1 %v2859_v3  ;;  %v4451_v3 = vld [vmem:[%s4561_s5 + $0xc0] sm:$0x3f] }
 0x66c   :  { %v2325_v7 = vmul.f32 %v3887_v5, %v4362_v56  ;;  %3671 = vmatprep.mubr.msk.f32.mxu1 %vm3924_vm1, %v3921_v27  ;;  %3756 = vmatprep.subr.bf16.mxu0 %v3755_v30  ;;  %v70_v56 = vld [vmem:[%s4561_s5 + $0xb8] sm:$0xff] }
 0x66d   :  { %3758 = vmatpush3.bf16.msra.mxu0 %v3755_v30  ;;  %v3775_v30 = vpack.c.bf16 %v40_v29, %v39_v18 }
 0x66e   :  { %3672 = vmatmul.mubr.msk.f32.vlgmr.msra.gmra.mrb[28].mxu1 %vm273_vm2, %v2325_v7 }
 0x700   :  { %v2474_v10 = vpop.f32.mrb[22].mxu1 }
 0x701   :  { %2936 = vrot.lane.b32.xlu0 %v2474_v10, %s3929_s29  ;;  %v3643_v13 = vpop.f32.mrb[23].mxu1 }
 0x731   :  { %v2398_v15 = vpop.f32.mrb[30].mxu0 }
 0x732   :  { %v3638_v17 = vpop.f32.mrb[31].mxu0 }
 0x735   :  { %v2550_v49 = vpop.f32.mrb[32].mxu0 }
 0x736   :  { %2944 = vrot.lane.b32.xlu0 %v2550_v49, %s3930_s30  ;;  %v3648_v20 = vpop.f32.mrb[33].mxu0 }
 0x739   :  { %v2626_v11 = vpop.f32.mrb[24].mxu1 }
 0x73a   :  { %v2702_v21 = vpop.f32.mrb[34].mxu0  ;;  %v3653_v24 = vpop.f32.mrb[25].mxu1  ;;  %2952 = vrot.lane.b32.xlu0 %v2626_v11, %s3931_s7 }
 0x73b   :  { %v3658_v19 = vpop.f32.mrb[35].mxu0 }
 0x73d   :  { %v2778_v27 = vpop.f32.mrb[26].mxu1 }
 0x73e   :  { %v2854_v28 = vpop.f32.mrb[36].mxu0  ;;  %2938 = vrot.lane.b32.xlu1 %v2778_v27, %s3929_s29  ;;  %v3663_v52 = vpop.f32.mrb[27].mxu1  ;;  %1586 = vrot.lane.b32.xlu0 %v4312_v2, %s3929_s29  ;;  %v65_v2 = vld [vmem:[%s4561_s5 + $0x90] sm:$0xff] }
 0x73f   :  { %v3668_v53 = vpop.f32.mrb[37].mxu0 }
 0x741   :  { %v2930_v57 = vpop.f32.mrb[28].mxu1 }
 0x742   :  { %v3673_v25 = vpop.f32.mrb[29].mxu1  ;;  %1594 = vrot.lane.b32.xlu0 %v4316_v6, %s3930_s30  ;;  %2946 = vrot.lane.b32.xlu1 %v2854_v28, %s3930_s30  ;;  %v66_v6 = vld [vmem:[%s4561_s5 + $0x98] sm:$0xff] }
 0x746   :  { %1602 = vrot.lane.b32.xlu0 %v4314_v4, %s3931_s7  ;;  %2954 = vrot.lane.b32.xlu1 %v2930_v57, %s3931_s7  ;;  %v3759_v4 = vpack.c.bf16 %v66_v6, %v65_v2  ;;  %v38_v57 = vld [vmem:[%s4559_s3 + $0x28] sm:$0xff]  ;;  %v47_v2 = vld [vmem:[%s4561_s5] sm:$0xff] }
 0x747   :  { %v48_v6 = vld [vmem:[%s4561_s5 + $0x8] sm:$0xff] }
 0x748   :  { %3760 = vmatprep.subr.bf16.mxu0 %v3759_v4 }
 0x749   :  { %3762 = vmatpush3.bf16.msra.mxu0 %v3759_v4  ;;  %v3779_v4 = vpack.c.bf16 %v48_v6, %v47_v2 }
 0x74a   :  { %1588 = vrot.lane.b32.xlu1 %v4318_v9, %s3929_s29  ;;  %v68_v9 = vld [vmem:[%s4561_s5 + $0xa8] sm:$0xff] }
 0x74e   :  { %1596 = vrot.lane.b32.xlu1 %v4327_v26, %s3930_s30  ;;  %v3763_v26 = vpack.c.bf16 %v68_v9, %v67_v31 }
 0x750   :  { %3764 = vmatprep.subr.bf16.mxu0 %v3763_v26 }
 0x751   :  { %3766 = vmatpush3.bf16.msra.mxu0 %v3763_v26 }
 0x752   :  { %1604 = vrot.lane.b32.xlu1 %v4322_v14, %s3931_s7  ;;  %v69_v14 = vld [vmem:[%s4561_s5 + $0xb0] sm:$0xff] }
 0x753   :  { %v3767_v37 = vpack.c.bf16 %v70_v56, %v69_v14 }
 0x755   :  { %3768 = vmatprep.subr.bf16.mxu0 %v3767_v37 }
 0x756   :  { %3770 = vmatpush3.bf16.msra.mxu0 %v3767_v37  ;;  %v3091_v37 = vsub.s32 2, %v4018_v22 }
 0x773   :  { %v2937_v32 = vpop.permute.xlu0 %2936 }
 0x774   :  { %v2958_v39 = vsel %vm273_vm2, %v2398_v15, %v2937_v32 }
 0x7a8   :  { %v2945_v38 = vpop.permute.xlu0 %2944 }
 0x7a9   :  { %v2960_v34 = vsel %vm1610_vm3, %v2958_v39, %v2945_v38  ;;  %v3097_v38 = vsub.s32 3, %v4018_v22  ;;  %v3092_v39 = vrot.slane %v4451_v3, %v3091_v37 }
 0x7ac   :  { %v2953_v59 = vpop.permute.xlu0 %2952 }
 0x7ad   :  { %v2962_v41 = vsel %vm1613_vm4, %v2960_v34, %v2953_v59 }
 0x7ae   :  { %2966 = vrot.lane.b32.xlu0 %v2962_v41, %s3928_s28  ;;  %v3098_v41 = vrot.slane %v4451_v3, %v3097_v38 }
 0x7b0   :  { %v2939_v55 = vpop.permute.xlu1 %2938  ;;  %v1587_v42 = vpop.permute.xlu0 %1586 }
 0x7b1   :  { %v1608_v54 = vsel %vm273_vm2, %v4290_v0, %v1587_v42  ;;  %v2959_v43 = vsel %vm273_vm2, %v2702_v21, %v2939_v55 }
 0x7b4   :  { %v1595_v44 = vpop.permute.xlu0 %1594  ;;  %v2947_v45 = vpop.permute.xlu1 %2946 }
 0x7b5   :  { %v1611_v35 = vsel %vm1610_vm3, %v1608_v54, %v1595_v44  ;;  %v2961_v48 = vsel %vm1610_vm3, %v2959_v43, %v2947_v45  ;;  %v49_v45 = vld [vmem:[%s4561_s5 + $0x10] sm:$0xff] }
 0x7b8   :  { %v1603_v40 = vpop.permute.xlu0 %1602  ;;  %v2955_v46 = vpop.permute.xlu1 %2954 }
 0x7b9   :  { %v1614_v60 = vsel %vm1613_vm4, %v1611_v35, %v1603_v40  ;;  %v2963_v61 = vsel %vm1613_vm4, %v2961_v48, %v2955_v46  ;;  %v50_v35 = vld [vmem:[%s4561_s5 + $0x18] sm:$0xff]  ;;  %v51_v46 = vld [vmem:[%s4561_s5 + $0x20] sm:$0xff] }
 0x7ba   :  { %2968 = vrot.lane.b32.xlu1 %v2963_v61, %s3928_s28  ;;  %v3783_v40 = vpack.c.bf16 %v50_v35, %v49_v45 }
 0x7bc   :  { %v1589_v50 = vpop.permute.xlu1 %1588 }
 0x7bd   :  { %v1609_v0 = vsel %vm273_vm2, %v4320_v12, %v1589_v50  ;;  %v2977_v12 = vrot.slane %v4451_v3, %v74_v23  ;;  %v53_v50 = vld [vmem:[%s4561_s5 + $0x30] sm:$0xff] }
 0x7c0   :  { %v1597_v47 = vpop.permute.xlu1 %1596 }
 0x7c1   :  { %v1612_v51 = vsel %vm1610_vm3, %v1609_v0, %v1597_v47  ;;  %v54_v0 = vld [vmem:[%s4561_s5 + $0x38] sm:$0xff] }
 0x7c2   :  { %v3791_v47 = vpack.c.bf16 %v54_v0, %v53_v50 }
 0x7c4   :  { %v1605_v58 = vpop.permute.xlu1 %1604 }
 0x7c5   :  { %v1615_v33 = vsel %vm1613_vm4, %v1612_v51, %v1605_v58  ;;  %v55_v51 = vld [vmem:[%s4561_s5 + $0x40] sm:$0xff]  ;;  %v56_v58 = vld [vmem:[%s4561_s5 + $0x48] sm:$0xff] }
 0x820   :  { %v2967_v62 = vpop.permute.xlu0 %2966 }
 0x821   :  { %v2972_v63 = vsel %vm76_vm0, %v1614_v60, %v2967_v62  ;;  %v52_v60 = vld [vmem:[%s4561_s5 + $0x28] sm:$0xff]  ;;  %v57_v62 = vld [vmem:[%s4561_s5 + $0x50] sm:$0xff] }
 0x822   :  { %3690 = vmatprep.mubr.msk.f32.mxu0 %vm2978_vm5, %v2972_v63  ;;  %v3787_v61 = vpack.c.bf16 %v52_v60, %v51_v46  ;;  %v58_v63 = vld [vmem:[%s4561_s5 + $0x58] sm:$0xff] }
 0x82c   :  { %v2969_v1 = vpop.permute.xlu1 %2968 }
 0x82d   :  { %v2973_v36 = vsel %vm76_vm0, %v1615_v33, %v2969_v1  ;;  %v3795_v33 = vpack.c.bf16 %v56_v58, %v55_v51  ;;  %v3799_v1 = vpack.c.bf16 %v58_v63, %v57_v62 }
 0x82e   :  { %3691 = vmatmul.mubr.msk.f32.vlgmr.msra.gmra.mrb[38].mxu0 %vm2978_vm5, %v2973_v36  ;;  %v59_v36 = vld [vmem:[%s4561_s5 + $0x60] sm:$0xff] }
 0x901   :  { %v3692_v5 = vpop.f32.mrb[38].mxu0 }
 0x902   :  { %v3057_v7 = vadd.f32 %v3692_v5, %v2977_v12  ;;  %v3051_v10 = vpop.f32.mrb[39].mxu0 }
 0x903   :  { %v3052_v13 = vadd.f32 %v3051_v10, %v2977_v12  ;;  %v60_v12 = vld [vmem:[%s4561_s5 + $0x68] sm:$0xff]  ;;  %v62_v10 = vld [vmem:[%s4561_s5 + $0x78] sm:$0xff] }
 0x904   :  { %v3061_v15 = vadd.f32 %v3057_v7, %v4009_v16  ;;  %v3803_v5 = vpack.c.bf16 %v60_v12, %v59_v36  ;;  %v61_v7 = vld [vmem:[%s4561_s5 + $0x70] sm:$0xff] }
 0x905   :  { %v3060_v17 = vadd.f32 %v3052_v13, %v3987_v8  ;;  %v37_v8 = vld [vmem:[%s4559_s3 + $0x20] sm:$0xff]  ;;  %v3807_v13 = vpack.c.bf16 %v62_v10, %v61_v7 }
 0x906   :  { %v3065_v49 = vsel %vm76_vm0, %v3061_v15, 0.0  ;;  %v3771_v25 = vpack.c.bf16 %v38_v57, %v37_v8 }
 0x907   :  { %3066 = vadd.xlane.f32.xlu1 %v3065_v49  ;;  %v3062_v20 = vsel %vm76_vm0, %v3060_v17, 0.0 }
 0x908   :  { %3063 = vadd.xlane.f32.xlu0 %v3062_v20  ;;  %3772 = vmatprep.subr.bf16.mxu1 %v3771_v25 }
 0x909   :  { %3774 = vmatpush3.bf16.msra.mxu1 %v3771_v25 }
 0x90a   :  { %3776 = vmatprep.subr.bf16.mxu1 %v3775_v30 }
 0x90d   :  { %3778 = vmatpush3.bf16.msra.mxu1 %v3775_v30 }
 0x90e   :  { %3780 = vmatprep.subr.bf16.mxu1 %v3779_v4 }
 0x994   :  { %v3067_v11 = vpop.xlane.xlu1 %3066 }
 0x995   :  { %v3070_v21 = vmul.f32 0.03125, %v3067_v11  ;;  %v3064_v24 = vpop.xlane.xlu0 %3063 }
 0x996   :  { %v3069_v19 = vmul.f32 0.03125, %v3064_v24 }
 0x997   :  { %v3072_v27 = vsub.f32 %v3061_v15, %v3070_v21  ;;  %v3103_v15 = vsub.s32 1, %v4018_v22 }
 0x998   :  { %v3071_v23 = vsub.f32 %v3060_v17, %v3069_v19  ;;  %v3896_v17 = vld [vmem:[%s4559_s3 + $0x40] sm:$0x3]  ;;  %s3932_s3 = smov [#allocation2]  }
 0x999   :  { %v3074_v53 = vmul.f32 %v3072_v27, %v3072_v27  ;;  %v3104_v49 = vrot.slane %v3896_v17, %v3103_v15  ;;  %s3314_s5 = sshll.u32 %s3932_s3, 4  ;;  %s3315_s5 = int_to_ptr.vmem [resolvable:$true] %s3314_s5 }
 0x99a   :  { %v3073_v28 = vmul.f32 %v3071_v23, %v3071_v23  ;;  %s3897_s13 = scalar_lea.vmem %s3315_s5, 256  ;;  %p3902_p1 = scmp.lt.s32.totalorder %s3315_s5, %s3315_s5 }
 0x99b   :  { %v3078_v16 = vsel %vm76_vm0, %v3074_v53, 0.0  ;;  %p3898_p0 = scmp.ne.s32.totalorder %s3315_s5, %s3897_s13  ;;  %p3903_p2 = scmp.lt.s32.totalorder %s3897_s13, %s3897_s13 }
 0x99c   :  { %v3075_v52 = vsel %vm76_vm0, %v3073_v28, 0.0 }
 0x99d   :  { %3076 = vadd.xlane.f32.xlu0 %v3075_v52  ;;  %p3904_p3 = por %p3903_p2, %p3902_p1 }
 0x99f   :  { %p3905_p4 = pnand %p3904_p3, %p3898_p0 }
 0x9a1   :  { %3079 = vadd.xlane.f32.xlu0 %v3078_v16 }
 0xa2a   :  { %v3077_v31 = vpop.xlane.xlu0 %3076 }
 0xa2b   :  { %v3081_v9 = vmul.f32 0.03125, %v3077_v31 }
 0xa2d   :  { %v3083_v26 = vadd.f32 1e-05, %v3081_v9 }
 0xa2e   :  { %v3080_v14 = vpop.xlane.xlu0 %3079 }
 0xa2f   :  { %3888 = vrsqrt.f32 %v3083_v26  ;;  %v3082_v56 = vmul.f32 0.03125, %v3080_v14 }
 0xa31   :  { %v3084_v32 = vadd.f32 1e-05, %v3082_v56 }
 0xa33   :  { %3890 = vrsqrt.f32 %v3084_v32 }
 0xa39   :  { %v3889_v34 = vpop.eup %3888 }
 0xa3a   :  { %v3087_v59 = vmul.f32 %v3889_v34, %v3071_v23  ;;  %v3191_v23 = vrot.slane %v4451_v3, %v3103_v15 }
 0xa3c   :  { %v3093_v55 = vmul.f32 %v3092_v39, %v3087_v59 }
 0xa3d   :  { %v3891_v42 = vpop.eup %3890 }
 0xa3e   :  { %v3088_v54 = vmul.f32 %v3891_v42, %v3072_v27  ;;  %v3099_v44 = vadd.f32 %v3098_v41, %v3093_v55  ;;  %v3303_v55 = vsub.s32 5, %v4018_v22 }
 0xa40   :  { %v3094_v43 = vmul.f32 %v3092_v39, %v3088_v54  ;;  %3701 = vmatprep.mubr.msk.f32.mxu1 %vm76_vm0, %v3099_v44  ;;  %v3304_v35 = vrot.slane %v4451_v3, %v3303_v55 }
 0xa42   :  { %v3100_v48 = vadd.f32 %v3098_v41, %v3094_v43  ;;  %v3297_v41 = vsub.s32 4, %v4018_v22 }
 0xa44   :  { %3702 = vmatmul.mubr.msk.f32.vlgmr.msra.gmra.mrb[30].mxu1 %vm76_vm0, %v3100_v48  ;;  %v3298_v42 = vrot.slane %v4451_v3, %v3297_v41 }
 0xa45   :  { %3782 = vmatpush3.bf16.msra.mxu1 %v3779_v4 }
 0xa46   :  { %3784 = vmatprep.subr.bf16.mxu1 %v3783_v40 }
 0xa49   :  { %3786 = vmatpush3.bf16.msra.mxu1 %v3783_v40 }
 0xa4a   :  { %3788 = vmatprep.subr.bf16.mxu1 %v3787_v61 }
 0xa4d   :  { %3790 = vmatpush3.bf16.msra.mxu1 %v3787_v61 }
 0xa4e   :  { %3792 = vmatprep.subr.bf16.mxu1 %v3791_v47 }
 0xa51   :  { %3794 = vmatpush3.bf16.msra.mxu1 %v3791_v47 }
 0xa52   :  { %3796 = vmatprep.subr.bf16.mxu1 %v3795_v33 }
 0xa55   :  { %3798 = vmatpush3.bf16.msra.mxu1 %v3795_v33 }
 0xa56   :  { %3800 = vmatprep.subr.bf16.mxu1 %v3799_v1 }
 0xa59   :  { %3802 = vmatpush3.bf16.msra.mxu1 %v3799_v1 }
 0xa5a   :  { %3804 = vmatprep.subr.bf16.mxu1 %v3803_v5 }
 0xa5d   :  { %3806 = vmatpush3.bf16.msra.mxu1 %v3803_v5 }
 0xa5e   :  { %3808 = vmatprep.subr.bf16.mxu1 %v3807_v13 }
 0xa61   :  { %3810 = vmatpush3.bf16.msra.mxu1 %v3807_v13 }
 0xb17   :  { %v3703_v20 = vpop.f32.mrb[30].mxu1 }
 0xb18   :  { %v3183_v11 = vadd.f32 %v3703_v20, %v3104_v49  ;;  %v3177_v21 = vpop.f32.mrb[31].mxu1 }
 0xb19   :  { %v3178_v24 = vadd.f32 %v3177_v21, %v3104_v49 }
 0xb1a   :  { %v3187_v27 = vmax.f32 %v3183_v11, 0.0 }
 0xb1b   :  { %v3186_v19 = vmax.f32 %v3178_v24, 0.0 }
 0xb1d   :  { %3736 = vmatprep.mubr.f32.mxu1 %v3186_v19 }
 0xb1e   :  { %3737 = vmatmul.mubr.f32.vlgmr.msra.gmra.mrb[32].mxu1 %v3187_v27 }
 0xbf1   :  { %v3738_v28 = vpop.f32.mrb[32].mxu1 }
 0xbf2   :  { %v3264_v52 = vadd.f32 %v3738_v28, %v3191_v23  ;;  %v3258_v53 = vpop.f32.mrb[33].mxu1 }
 0xbf3   :  { %v3259_v16 = vadd.f32 %v3258_v53, %v3191_v23 }
 0xbf4   :  { %v3268_v8 = vadd.f32 %v3264_v52, %v3100_v48 }
 0xbf5   :  { %v3267_v57 = vadd.f32 %v3259_v16, %v3099_v44 }
 0xbf6   :  { %v3272_v25 = vsel %vm76_vm0, %v3268_v8, 0.0 }
 0xbf7   :  { %3273 = vadd.xlane.f32.xlu0 %v3272_v25  ;;  %v3269_v18 = vsel %vm76_vm0, %v3267_v57, 0.0 }
 0xbf8   :  { %3270 = vadd.xlane.f32.xlu1 %v3269_v18 }
 0xc84   :  { %v3274_v29 = vpop.xlane.xlu0 %3273 }
 0xc85   :  { %v3276_v30 = vmul.f32 0.03125, %v3274_v29  ;;  %v3271_v2 = vpop.xlane.xlu1 %3270 }
 0xc86   :  { %v3275_v6 = vmul.f32 0.03125, %v3271_v2 }
 0xc87   :  { %v3278_v4 = vsub.f32 %v3268_v8, %v3276_v30 }
 0xc88   :  { %v3277_v31 = vsub.f32 %v3267_v57, %v3275_v6 }
 0xc89   :  { %v3280_v9 = vmul.f32 %v3278_v4, %v3278_v4 }
 0xc8a   :  { %v3279_v26 = vmul.f32 %v3277_v31, %v3277_v31 }
 0xc8b   :  { %v3284_v14 = vsel %vm76_vm0, %v3280_v9, 0.0 }
 0xc8c   :  { %3285 = vadd.xlane.f32.xlu0 %v3284_v14  ;;  %v3281_v56 = vsel %vm76_vm0, %v3279_v26, 0.0 }
 0xc8d   :  { %3282 = vadd.xlane.f32.xlu1 %v3281_v56 }
 0xd19   :  { %v3286_v32 = vpop.xlane.xlu0 %3285 }
 0xd1a   :  { %v3288_v37 = vmul.f32 0.03125, %v3286_v32  ;;  %v3283_v38 = vpop.xlane.xlu1 %3282 }
 0xd1b   :  { %v3287_v39 = vmul.f32 0.03125, %v3283_v38 }
 0xd1c   :  { %v3290_v34 = vadd.f32 1e-05, %v3288_v37 }
 0xd1d   :  { %v3289_v59 = vadd.f32 1e-05, %v3287_v39 }
 0xd1e   :  { %3892 = vrsqrt.f32 %v3290_v34 }
 0xd1f   :  { %3894 = vrsqrt.f32 %v3289_v59 }
 0xd28   :  { %v3893_v54 = vpop.eup %3892 }
 0xd29   :  { %v3895_v44 = vpop.eup %3894  ;;  %v3294_v45 = vmul.f32 %v3893_v54, %v3278_v4 }
 0xd2a   :  { %v3293_v43 = vmul.f32 %v3895_v44, %v3277_v31 }
 0xd2b   :  { %v3300_v48 = vmul.f32 %v3298_v42, %v3294_v45 }
 0xd2c   :  { %v3299_v40 = vmul.f32 %v3298_v42, %v3293_v43 }
 0xd2d   :  { %v3306_v46 = vadd.f32 %v3304_v35, %v3300_v48 }
 0xd2e   :  { %v3305_v60 = vadd.f32 %v3304_v35, %v3299_v40 }
 0xd2f   :  { %3308 = vst.msk [vmem:[#allocation2 + $0x8] sm:$0xff] %vm76_vm0, %v3306_v46 }
 0xd30   :  { %3307 = vst.msk [vmem:[#allocation2] sm:$0xff] %vm76_vm0, %v3305_v60 }
 0xd31   :  { %3908 = shalt.err (!%p3905_p4)
}
 0xd32   :  { %s3909_s16 = scalar_lea.hbm %s4562_s6, 256 }
 0xd33   :  { %p3910_p5 = scmp.ne.s32.totalorder %s4562_s6, %s3909_s16  ;;  %p3913_p6 = scmp.lt.u32.totalorder %s3909_s16, %s4562_s6 }
 0xd35   :  { %p3915_p7 = pnand %p3913_p6, %p3910_p5 }
 0xd37   :  { %3918 = shalt.err (!%p3915_p7)
}
 0xd38   :  { %s3933_s20 = smov 128  }
 0xd39   :  { %3320 = dma.vmem_to_hbm [thread:$0]  %s3315_s5, 256, %s4562_s6, [#allocation3], %s3933_s20, %s3933_s20, %s3929_s29  }
 0xd3a   :  { %3919 = dma.done.wait [#allocation3], 256  }
 0xd3b   :  { %3920 = vsyncadd [#allocation3], 4294967040 }
 0xd3c   :  { %3324 = vsyncpa [#allocation3], 1 }

</bundles_post_ra>
